<compile_context>
chip_gen: v5e
topology: v5e:2x2
jax: 0.10.0
libtpu: 0.0.40
codegen_flags: <defaults>
</compile_context>

<pallas_src>
import functools

import jax
import jax.numpy as jnp
from jax.experimental import pallas as pl
from jax.experimental.pallas import tpu as pltpu

_LN_EPS = 1e-5
_NEG_INF = -1e9


def _layernorm(x, w, b, eps=_LN_EPS):
    mu = jnp.mean(x, axis=-1, keepdims=True)
    xc = x - mu
    var = jnp.mean(xc * xc, axis=-1, keepdims=True)
    return xc * jax.lax.rsqrt(var + eps) * w + b


def _quick_gelu(x):
    # CLIP uses QuickGELU: x * sigmoid(1.702 x)
    return x * (1.0 / (1.0 + jnp.exp(-1.702 * x)))


def _causal_mask_jax(seq_len, dtype=jnp.float32):
    row = jnp.arange(seq_len)[:, None]
    col = jnp.arange(seq_len)[None, :]
    return jnp.where(col <= row, 0.0, _NEG_INF).astype(dtype)


# --------------------------------------------------------------------------
# Kernel 1: one fused residual attention block (pre-LN attention + MLP).
# Processes a tile of `tb` classes per grid step; weights stay VMEM-resident.
# --------------------------------------------------------------------------
def _encoder_block_kernel(*refs, num_heads, add_pos):
    if add_pos:
        (x_ref, pos_ref,
         ln1w_ref, ln1b_ref, wqkv_ref, bqkv_ref, wo_ref, bo_ref,
         ln2w_ref, ln2b_ref, wfc_ref, bfc_ref, wpr_ref, bpr_ref,
         out_ref) = refs
    else:
        (x_ref,
         ln1w_ref, ln1b_ref, wqkv_ref, bqkv_ref, wo_ref, bo_ref,
         ln2w_ref, ln2b_ref, wfc_ref, bfc_ref, wpr_ref, bpr_ref,
         out_ref) = refs
        pos_ref = None

    tb, seq_len, dim = x_ref.shape
    x = x_ref[...].astype(jnp.float32)                            # (tb, L, D)
    if add_pos:
        x = x + pos_ref[...].astype(jnp.float32)[None, :, :]

    # Causal mask built in-kernel (2-D iota; no HBM input needed).
    rows = jax.lax.broadcasted_iota(jnp.int32, (seq_len, seq_len), 0)
    cols = jax.lax.broadcasted_iota(jnp.int32, (seq_len, seq_len), 1)
    mask = jnp.where(cols <= rows, 0.0, _NEG_INF).astype(jnp.float32)[None]

    # ---- multi-head self-attention sub-block ------------------------------
    h = _layernorm(x, ln1w_ref[0, :].astype(jnp.float32),
                   ln1b_ref[0, :].astype(jnp.float32))
    qkv = jnp.dot(h.reshape(tb * seq_len, dim),
                  wqkv_ref[...].astype(jnp.float32),
                  preferred_element_type=jnp.float32)
    qkv = (qkv + bqkv_ref[0, :].astype(jnp.float32)).reshape(tb, seq_len, 3 * dim)

    dh = dim // num_heads
    scale = float(dh) ** -0.5

    head_outs = []
    for hh in range(num_heads):
        q = qkv[:, :, hh * dh:(hh + 1) * dh] * scale
        k = qkv[:, :, dim + hh * dh:dim + (hh + 1) * dh]
        v = qkv[:, :, 2 * dim + hh * dh:2 * dim + (hh + 1) * dh]
        s = jnp.einsum('bqd,bkd->bqk', q, k,
                       preferred_element_type=jnp.float32) + mask
        s = s - jnp.max(s, axis=-1, keepdims=True)
        p = jnp.exp(s)
        p = p / jnp.sum(p, axis=-1, keepdims=True)
        head_outs.append(jnp.einsum('bqk,bkd->bqd', p, v,
                                    preferred_element_type=jnp.float32))
    attn = jnp.concatenate(head_outs, axis=-1)                    # (tb, L, D)
    attn = jnp.dot(attn.reshape(tb * seq_len, dim),
                   wo_ref[...].astype(jnp.float32),
                   preferred_element_type=jnp.float32)
    attn = attn + bo_ref[0, :].astype(jnp.float32)
    x = x + attn.reshape(tb, seq_len, dim)

    # ---- MLP sub-block (QuickGELU) -----------------------------------------
    h = _layernorm(x, ln2w_ref[0, :].astype(jnp.float32),
                   ln2b_ref[0, :].astype(jnp.float32))
    ff = jnp.dot(h.reshape(tb * seq_len, dim),
                 wfc_ref[...].astype(jnp.float32),
                 preferred_element_type=jnp.float32)
    ff = _quick_gelu(ff + bfc_ref[0, :].astype(jnp.float32))
    ff = jnp.dot(ff, wpr_ref[...].astype(jnp.float32),
                 preferred_element_type=jnp.float32)
    ff = ff + bpr_ref[0, :].astype(jnp.float32)
    x = x + ff.reshape(tb, seq_len, dim)

    out_ref[...] = x.astype(out_ref.dtype)


def _run_block(x, pos, layer, *, num_heads, class_block, add_pos):
    n_cls_p, seq_len, dim = x.shape

    def resident(arr):
        return pl.BlockSpec(arr.shape, lambda i: (0, 0))

    act_spec = pl.BlockSpec((class_block, seq_len, dim), lambda i: (i, 0, 0))

    weight_arrays = [
        layer['ln1_w'], layer['ln1_b'], layer['w_qkv'], layer['b_qkv'],
        layer['w_o'], layer['b_o'], layer['ln2_w'], layer['ln2_b'],
        layer['w_fc'], layer['b_fc'], layer['w_proj'], layer['b_proj'],
    ]

    in_specs = [act_spec]
    args = [x]
    if add_pos:
        in_specs.append(resident(pos))
        args.append(pos)
    in_specs += [resident(w) for w in weight_arrays]
    args += weight_arrays

    kernel = functools.partial(_encoder_block_kernel,
                               num_heads=num_heads, add_pos=add_pos)
    return pl.pallas_call(
        kernel,
        out_shape=jax.ShapeDtypeStruct((n_cls_p, seq_len, dim), x.dtype),
        grid_spec=pltpu.PrefetchScalarGridSpec(
            num_scalar_prefetch=0,
            grid=(n_cls_p // class_block,),
            in_specs=in_specs,
            out_specs=act_spec,
        ),
        compiler_params=pltpu.CompilerParams(
            dimension_semantics=("parallel",)),
    )(*args)


# --------------------------------------------------------------------------
# Kernel 2: ln_final + EOS-position gather + text projection (fused).
# EOS index per class is scalar-prefetched; only one row is normed/projected.
# --------------------------------------------------------------------------
def _final_kernel(eos_ref, x_ref, lnw_ref, lnb_ref, proj_ref, out_ref):
    i = pl.program_id(0)
    pos = eos_ref[i]
    row = x_ref[0, pl.ds(pos, 1), :].astype(jnp.float32)          # (1, D)
    row = _layernorm(row, lnw_ref[0, :].astype(jnp.float32),
                     lnb_ref[0, :].astype(jnp.float32))
    out = jnp.dot(row, proj_ref[...].astype(jnp.float32),
                  preferred_element_type=jnp.float32)             # (1, E)
    out_ref[0] = out.astype(out_ref.dtype)


# --------------------------------------------------------------------------
# Wrapper: full TextEncoder.forward
# --------------------------------------------------------------------------
def text_encoder_forward(prompts, tokenized_prompts, params, *, num_heads,
                         class_block=8):
    n_cls, seq_len, dim = prompts.shape
    embed_dim = params['text_projection'].shape[1]

    # Tile classes per grid step; keep >= 2 grid blocks whenever possible so the
    # two v7x TensorCores both get work.  Pad n_cls up to a multiple of the tile.
    tb = max(1, min(class_block, (n_cls + 1) // 2))
    pad = (-n_cls) % tb
    x = jnp.pad(prompts, ((0, pad), (0, 0), (0, 0))) if pad else prompts

    for li, layer in enumerate(params['layers']):
        x = _run_block(x, params['pos'], layer, num_heads=num_heads,
                       class_block=tb, add_pos=(li == 0))
    x = x[:n_cls]

    eos_idx = jnp.argmax(tokenized_prompts, axis=-1).astype(jnp.int32)

    out = pl.pallas_call(
        _final_kernel,
        out_shape=jax.ShapeDtypeStruct((n_cls, 1, embed_dim), prompts.dtype),
        grid_spec=pltpu.PrefetchScalarGridSpec(
            num_scalar_prefetch=1,
            grid=(n_cls,),
            in_specs=[
                pl.BlockSpec((1, seq_len, dim), lambda i, eos: (i, 0, 0)),
                pl.BlockSpec((1, dim), lambda i, eos: (0, 0)),
                pl.BlockSpec((1, dim), lambda i, eos: (0, 0)),
                pl.BlockSpec((dim, embed_dim), lambda i, eos: (0, 0)),
            ],
            out_specs=pl.BlockSpec((1, 1, embed_dim), lambda i, eos: (i, 0, 0)),
        ),
        compiler_params=pltpu.CompilerParams(
            dimension_semantics=("parallel",)),
    )(eos_idx, x, params['lnf_w'], params['lnf_b'], params['text_projection'])
    return out[:, 0, :]


# --------------------------------------------------------------------------
# Pure-JAX reference and synthetic parameter construction
# --------------------------------------------------------------------------
def _reference_forward(prompts, tokenized_prompts, params, *, num_heads):
    x = prompts.astype(jnp.float32) + params['pos'].astype(jnp.float32)[None]
    n_cls, seq_len, dim = x.shape
    dh = dim // num_heads
    scale = float(dh) ** -0.5
    mask = _causal_mask_jax(seq_len, jnp.float32)
    for lp in params['layers']:
        h = _layernorm(x, lp['ln1_w'], lp['ln1_b'])
        qkv = h @ lp['w_qkv'] + lp['b_qkv']
        q, k, v = qkv[..., :dim], qkv[..., dim:2 * dim], qkv[..., 2 * dim:]
        q = q.reshape(n_cls, seq_len, num_heads, dh) * scale
        k = k.reshape(n_cls, seq_len, num_heads, dh)
        v = v.reshape(n_cls, seq_len, num_heads, dh)
        s = jnp.einsum('bqhd,bkhd->bhqk', q, k) + mask[None, None]
        s = s - jnp.max(s, axis=-1, keepdims=True)
        p = jnp.exp(s)
        p = p / jnp.sum(p, axis=-1, keepdims=True)
        o = jnp.einsum('bhqk,bkhd->bqhd', p, v).reshape(n_cls, seq_len, dim)
        x = x + (o @ lp['w_o'] + lp['b_o'])
        h = _layernorm(x, lp['ln2_w'], lp['ln2_b'])
        ff = _quick_gelu(h @ lp['w_fc'] + lp['b_fc'])
        x = x + (ff @ lp['w_proj'] + lp['b_proj'])
    x = _layernorm(x, params['lnf_w'], params['lnf_b'])
    eos = jnp.argmax(tokenized_prompts, axis=-1)
    pooled = x[jnp.arange(n_cls), eos]
    return pooled @ params['text_projection']


def _init_params(key, *, seq_len, dim, hidden, embed_dim, n_layers, dtype):
    def nrm(k, shape, scale=0.02):
        return (scale * jax.random.normal(k, shape)).astype(dtype)

    keys = iter(jax.random.split(key, 10 * n_layers + 4))
    layers = []
    for _ in range(n_layers):
        layers.append(dict(
            ln1_w=(jnp.ones((1, dim)) + 0.01 * jax.random.normal(
                next(keys), (1, dim))).astype(dtype),
            ln1_b=nrm(next(keys), (1, dim), 0.01),
            w_qkv=nrm(next(keys), (dim, 3 * dim)),
            b_qkv=nrm(next(keys), (1, 3 * dim), 0.01),
            w_o=nrm(next(keys), (dim, dim)),
            b_o=nrm(next(keys), (1, dim), 0.01),
            ln2_w=jnp.ones((1, dim), dtype),
            ln2_b=jnp.zeros((1, dim), dtype),
            w_fc=nrm(next(keys), (dim, hidden)),
            b_fc=nrm(next(keys), (1, hidden), 0.01),
            w_proj=nrm(next(keys), (hidden, dim)),
            b_proj=jnp.zeros((1, dim), dtype),
        ))
    return dict(
        pos=nrm(next(keys), (seq_len, dim), 0.01),
        layers=layers,
        lnf_w=jnp.ones((1, dim), dtype),
        lnf_b=jnp.zeros((1, dim), dtype),
        text_projection=nrm(next(keys), (dim, embed_dim)),
    )


if __name__ == "__main__":
    # Small CLIP-like synthetic shapes.
    n_cls, seq_len, dim = 4, 16, 64          # classes, token length, text width
    num_heads, hidden, embed_dim, n_layers = 4, 256, 32, 2
    dtype = jnp.float32

    root = jax.random.PRNGKey(0)
    k_prompt, k_tok, k_param = jax.random.split(root, 3)

    prompts = jax.random.normal(k_prompt, (n_cls, seq_len, dim), dtype=dtype)

    # Synthetic tokenized prompts: the EOS token (largest id) sits at a known
    # position per class, mirroring CLIP's argmax-based EOS lookup.
    eos_pos = jnp.array([5, 9, 12, 7], dtype=jnp.int32)
    tokenized = jax.random.randint(k_tok, (n_cls, seq_len), 1, 100)
    tokenized = tokenized.at[jnp.arange(n_cls), eos_pos].set(1000)

    params = _init_params(k_param, seq_len=seq_len, dim=dim, hidden=hidden,
                          embed_dim=embed_dim, n_layers=n_layers, dtype=dtype)

    out = text_encoder_forward(prompts, tokenized, params,
                               num_heads=num_heads, class_block=8)
    out = jax.block_until_ready(out)

    with jax.default_matmul_precision("highest"):
        ref = _reference_forward(prompts, tokenized, params,
                                 num_heads=num_heads)
        ref = jax.block_until_ready(ref)

    assert out.shape == (n_cls, embed_dim), out.shape
    max_err = float(jnp.max(jnp.abs(out - ref)))
    assert jnp.allclose(out, ref, atol=2e-2, rtol=2e-2), max_err
    print("KERNEL_OK")
</pallas_src>

<mosaic_0001>
module attributes {stable_mosaic.version = 11 : i64} {
  func.func @_encoder_block_kernel(%arg0: i32, %arg1: memref<2x16x64xf32, #tpu.memory_space<vmem>>, %arg2: memref<16x64xf32, #tpu.memory_space<vmem>>, %arg3: memref<1x64xf32, #tpu.memory_space<vmem>>, %arg4: memref<1x64xf32, #tpu.memory_space<vmem>>, %arg5: memref<64x192xf32, #tpu.memory_space<vmem>>, %arg6: memref<1x192xf32, #tpu.memory_space<vmem>>, %arg7: memref<64x64xf32, #tpu.memory_space<vmem>>, %arg8: memref<1x64xf32, #tpu.memory_space<vmem>>, %arg9: memref<1x64xf32, #tpu.memory_space<vmem>>, %arg10: memref<1x64xf32, #tpu.memory_space<vmem>>, %arg11: memref<64x256xf32, #tpu.memory_space<vmem>>, %arg12: memref<1x256xf32, #tpu.memory_space<vmem>>, %arg13: memref<256x64xf32, #tpu.memory_space<vmem>>, %arg14: memref<1x64xf32, #tpu.memory_space<vmem>>, %arg15: memref<2x16x64xf32, #tpu.memory_space<vmem>>) attributes {dimension_semantics = [#tpu.dimension_semantics<parallel>], iteration_bounds = array<i64: 2>, scalar_prefetch = 0 : i64, scratch_operands = 0 : i64, tpu.core_type = #tpu.core_type<tc>, window_params = [{transform_indices = @transform_0, window_bounds = array<i64: 2, 16, 64>}, {pipeline_mode = #tpu.pipeline_mode<synchronous>, transform_indices = @transform_1, window_bounds = array<i64: 16, 64>}, {pipeline_mode = #tpu.pipeline_mode<synchronous>, transform_indices = @transform_2, window_bounds = array<i64: 1, 64>}, {pipeline_mode = #tpu.pipeline_mode<synchronous>, transform_indices = @transform_3, window_bounds = array<i64: 1, 64>}, {pipeline_mode = #tpu.pipeline_mode<synchronous>, transform_indices = @transform_4, window_bounds = array<i64: 64, 192>}, {pipeline_mode = #tpu.pipeline_mode<synchronous>, transform_indices = @transform_5, window_bounds = array<i64: 1, 192>}, {pipeline_mode = #tpu.pipeline_mode<synchronous>, transform_indices = @transform_6, window_bounds = array<i64: 64, 64>}, {pipeline_mode = #tpu.pipeline_mode<synchronous>, transform_indices = @transform_7, window_bounds = array<i64: 1, 64>}, {pipeline_mode = #tpu.pipeline_mode<synchronous>, transform_indices = @transform_8, window_bounds = array<i64: 1, 64>}, {pipeline_mode = #tpu.pipeline_mode<synchronous>, transform_indices = @transform_9, window_bounds = array<i64: 1, 64>}, {pipeline_mode = #tpu.pipeline_mode<synchronous>, transform_indices = @transform_10, window_bounds = array<i64: 64, 256>}, {pipeline_mode = #tpu.pipeline_mode<synchronous>, transform_indices = @transform_11, window_bounds = array<i64: 1, 256>}, {pipeline_mode = #tpu.pipeline_mode<synchronous>, transform_indices = @transform_12, window_bounds = array<i64: 256, 64>}, {pipeline_mode = #tpu.pipeline_mode<synchronous>, transform_indices = @transform_13, window_bounds = array<i64: 1, 64>}, {transform_indices = @transform_14, window_bounds = array<i64: 2, 16, 64>}]} {
    %c0 = arith.constant 0 : index
    %c0_0 = arith.constant 0 : index
    %c0_1 = arith.constant 0 : index
    %0 = vector.load %arg1[%c0, %c0_0, %c0_1] : memref<2x16x64xf32, #tpu.memory_space<vmem>>, vector<2x16x64xf32>
    %c0_2 = arith.constant 0 : index
    %c0_3 = arith.constant 0 : index
    %1 = vector.load %arg2[%c0_2, %c0_3] : memref<16x64xf32, #tpu.memory_space<vmem>>, vector<16x64xf32>
    %2 = vector.shape_cast %1 : vector<16x64xf32> to vector<1x16x64xf32>
    %3 = vector.broadcast %2 : vector<1x16x64xf32> to vector<2x16x64xf32>
    %4 = arith.addf %0, %3 : vector<2x16x64xf32>
    %5 = tpu.iota {dimensions = array<i32: 0>} : vector<16x16xi32>
    %6 = tpu.iota {dimensions = array<i32: 1>} : vector<16x16xi32>
    %7 = arith.cmpi sle, %6, %5 : vector<16x16xi32>
    %cst = arith.constant 0.000000e+00 : f32
    %cst_4 = arith.constant -1.000000e+09 : f32
    %8 = vector.broadcast %cst : f32 to vector<16x16xf32>
    %9 = vector.broadcast %cst_4 : f32 to vector<16x16xf32>
    %10 = arith.select %7, %8, %9 : vector<16x16xi1>, vector<16x16xf32>
    %11 = vector.shape_cast %10 : vector<16x16xf32> to vector<1x16x16xf32>
    %c0_5 = arith.constant 0 : index
    %c0_6 = arith.constant 0 : index
    %12 = vector.load %arg3[%c0_5, %c0_6] : memref<1x64xf32, #tpu.memory_space<vmem>>, vector<1x64xf32>
    %13 = vector.shape_cast %12 : vector<1x64xf32> to vector<64xf32>
    %c0_7 = arith.constant 0 : index
    %c0_8 = arith.constant 0 : index
    %14 = vector.load %arg4[%c0_7, %c0_8] : memref<1x64xf32, #tpu.memory_space<vmem>>, vector<1x64xf32>
    %15 = vector.shape_cast %14 : vector<1x64xf32> to vector<64xf32>
    %cst_9 = arith.constant dense<0.000000e+00> : vector<2x16xf32>
    %16 = vector.multi_reduction <add>, %4, %cst_9 [2] : vector<2x16x64xf32> to vector<2x16xf32>
    %17 = vector.shape_cast %16 : vector<2x16xf32> to vector<2x16x1xf32>
    %cst_10 = arith.constant 6.400000e+01 : f32
    %18 = vector.broadcast %cst_10 : f32 to vector<2x16x1xf32>
    %19 = arith.divf %17, %18 : vector<2x16x1xf32>
    %20 = vector.broadcast %19 : vector<2x16x1xf32> to vector<2x16x64xf32>
    %21 = arith.subf %4, %20 : vector<2x16x64xf32>
    %22 = arith.mulf %21, %21 : vector<2x16x64xf32>
    %cst_11 = arith.constant dense<0.000000e+00> : vector<2x16xf32>
    %23 = vector.multi_reduction <add>, %22, %cst_11 [2] : vector<2x16x64xf32> to vector<2x16xf32>
    %24 = vector.shape_cast %23 : vector<2x16xf32> to vector<2x16x1xf32>
    %cst_12 = arith.constant 6.400000e+01 : f32
    %25 = vector.broadcast %cst_12 : f32 to vector<2x16x1xf32>
    %26 = arith.divf %24, %25 : vector<2x16x1xf32>
    %cst_13 = arith.constant 9.99999974E-6 : f32
    %27 = vector.broadcast %cst_13 : f32 to vector<2x16x1xf32>
    %28 = arith.addf %26, %27 : vector<2x16x1xf32>
    %29 = math.rsqrt %28 : vector<2x16x1xf32>
    %30 = vector.broadcast %29 : vector<2x16x1xf32> to vector<2x16x64xf32>
    %31 = arith.mulf %21, %30 : vector<2x16x64xf32>
    %32 = vector.shape_cast %13 : vector<64xf32> to vector<1x1x64xf32>
    %33 = vector.broadcast %32 : vector<1x1x64xf32> to vector<2x16x64xf32>
    %34 = arith.mulf %31, %33 : vector<2x16x64xf32>
    %35 = vector.shape_cast %15 : vector<64xf32> to vector<1x1x64xf32>
    %36 = vector.broadcast %35 : vector<1x1x64xf32> to vector<2x16x64xf32>
    %37 = arith.addf %34, %36 : vector<2x16x64xf32>
    %38 = vector.shape_cast %37 : vector<2x16x64xf32> to vector<32x64xf32>
    %c0_14 = arith.constant 0 : index
    %c0_15 = arith.constant 0 : index
    %39 = vector.load %arg5[%c0_14, %c0_15] : memref<64x192xf32, #tpu.memory_space<vmem>>, vector<64x192xf32>
    %cst_16 = arith.constant dense<0.000000e+00> : vector<32x192xf32>
    %40 = tpu.matmul %38, %39, %cst_16 {dimension_numbers = #tpu.dot_dimension_numbers<[1], [0], [0], [1], [0, 0, 1, 1], [], []>} : vector<32x64xf32>, vector<64x192xf32>, vector<32x192xf32> -> vector<32x192xf32>
    %c0_17 = arith.constant 0 : index
    %c0_18 = arith.constant 0 : index
    %41 = vector.load %arg6[%c0_17, %c0_18] : memref<1x192xf32, #tpu.memory_space<vmem>>, vector<1x192xf32>
    %42 = vector.shape_cast %41 : vector<1x192xf32> to vector<192xf32>
    %43 = vector.shape_cast %42 : vector<192xf32> to vector<1x192xf32>
    %44 = vector.broadcast %43 : vector<1x192xf32> to vector<32x192xf32>
    %45 = arith.addf %40, %44 : vector<32x192xf32>
    %46 = vector.shape_cast %45 : vector<32x192xf32> to vector<2x16x192xf32>
    %47 = vector.extract_strided_slice %46 {offsets = [0, 0, 0], sizes = [2, 16, 16], strides = [1, 1, 1]} : vector<2x16x192xf32> to vector<2x16x16xf32>
    %cst_19 = arith.constant 2.500000e-01 : f32
    %48 = vector.broadcast %cst_19 : f32 to vector<2x16x16xf32>
    %49 = arith.mulf %47, %48 : vector<2x16x16xf32>
    %50 = vector.extract_strided_slice %46 {offsets = [0, 0, 64], sizes = [2, 16, 16], strides = [1, 1, 1]} : vector<2x16x192xf32> to vector<2x16x16xf32>
    %51 = vector.extract_strided_slice %46 {offsets = [0, 0, 128], sizes = [2, 16, 16], strides = [1, 1, 1]} : vector<2x16x192xf32> to vector<2x16x16xf32>
    "tpu.trace_start"() <{level = 10 : i32, message = "bqd,bkd->bqk"}> : () -> ()
    %cst_20 = arith.constant dense<0.000000e+00> : vector<2x16x16xf32>
    %52 = tpu.matmul %49, %50, %cst_20 {dimension_numbers = #tpu.dot_dimension_numbers<[2], [2], [1], [1], [0, 0, 0, 1, 1, 1], [0], [0]>} : vector<2x16x16xf32>, vector<2x16x16xf32>, vector<2x16x16xf32> -> vector<2x16x16xf32>
    "tpu.trace_stop"() : () -> ()
    %53 = vector.broadcast %11 : vector<1x16x16xf32> to vector<2x16x16xf32>
    %54 = arith.addf %52, %53 : vector<2x16x16xf32>
    %cst_21 = arith.constant dense<0xFF800000> : vector<2x16xf32>
    %55 = vector.multi_reduction <maximumf>, %54, %cst_21 [2] : vector<2x16x16xf32> to vector<2x16xf32>
    %56 = vector.shape_cast %55 : vector<2x16xf32> to vector<2x16x1xf32>
    %57 = vector.broadcast %56 : vector<2x16x1xf32> to vector<2x16x16xf32>
    %58 = arith.subf %54, %57 : vector<2x16x16xf32>
    %59 = math.exp %58 : vector<2x16x16xf32>
    %cst_22 = arith.constant dense<0.000000e+00> : vector<2x16xf32>
    %60 = vector.multi_reduction <add>, %59, %cst_22 [2] : vector<2x16x16xf32> to vector<2x16xf32>
    %61 = vector.shape_cast %60 : vector<2x16xf32> to vector<2x16x1xf32>
    %62 = vector.broadcast %61 : vector<2x16x1xf32> to vector<2x16x16xf32>
    %63 = arith.divf %59, %62 : vector<2x16x16xf32>
    "tpu.trace_start"() <{level = 10 : i32, message = "bqk,bkd->bqd"}> : () -> ()
    %cst_23 = arith.constant dense<0.000000e+00> : vector<2x16x16xf32>
    %64 = tpu.matmul %63, %51, %cst_23 {dimension_numbers = #tpu.dot_dimension_numbers<[2], [1], [1], [2], [0, 0, 0, 1, 1, 2], [0], [0]>} : vector<2x16x16xf32>, vector<2x16x16xf32>, vector<2x16x16xf32> -> vector<2x16x16xf32>
    "tpu.trace_stop"() : () -> ()
    %65 = vector.extract_strided_slice %46 {offsets = [0, 0, 16], sizes = [2, 16, 16], strides = [1, 1, 1]} : vector<2x16x192xf32> to vector<2x16x16xf32>
    %cst_24 = arith.constant 2.500000e-01 : f32
    %66 = vector.broadcast %cst_24 : f32 to vector<2x16x16xf32>
    %67 = arith.mulf %65, %66 : vector<2x16x16xf32>
    %68 = vector.extract_strided_slice %46 {offsets = [0, 0, 80], sizes = [2, 16, 16], strides = [1, 1, 1]} : vector<2x16x192xf32> to vector<2x16x16xf32>
    %69 = vector.extract_strided_slice %46 {offsets = [0, 0, 144], sizes = [2, 16, 16], strides = [1, 1, 1]} : vector<2x16x192xf32> to vector<2x16x16xf32>
    "tpu.trace_start"() <{level = 10 : i32, message = "bqd,bkd->bqk"}> : () -> ()
    %cst_25 = arith.constant dense<0.000000e+00> : vector<2x16x16xf32>
    %70 = tpu.matmul %67, %68, %cst_25 {dimension_numbers = #tpu.dot_dimension_numbers<[2], [2], [1], [1], [0, 0, 0, 1, 1, 1], [0], [0]>} : vector<2x16x16xf32>, vector<2x16x16xf32>, vector<2x16x16xf32> -> vector<2x16x16xf32>
    "tpu.trace_stop"() : () -> ()
    %71 = vector.broadcast %11 : vector<1x16x16xf32> to vector<2x16x16xf32>
    %72 = arith.addf %70, %71 : vector<2x16x16xf32>
    %cst_26 = arith.constant dense<0xFF800000> : vector<2x16xf32>
    %73 = vector.multi_reduction <maximumf>, %72, %cst_26 [2] : vector<2x16x16xf32> to vector<2x16xf32>
    %74 = vector.shape_cast %73 : vector<2x16xf32> to vector<2x16x1xf32>
    %75 = vector.broadcast %74 : vector<2x16x1xf32> to vector<2x16x16xf32>
    %76 = arith.subf %72, %75 : vector<2x16x16xf32>
    %77 = math.exp %76 : vector<2x16x16xf32>
    %cst_27 = arith.constant dense<0.000000e+00> : vector<2x16xf32>
    %78 = vector.multi_reduction <add>, %77, %cst_27 [2] : vector<2x16x16xf32> to vector<2x16xf32>
    %79 = vector.shape_cast %78 : vector<2x16xf32> to vector<2x16x1xf32>
    %80 = vector.broadcast %79 : vector<2x16x1xf32> to vector<2x16x16xf32>
    %81 = arith.divf %77, %80 : vector<2x16x16xf32>
    "tpu.trace_start"() <{level = 10 : i32, message = "bqk,bkd->bqd"}> : () -> ()
    %cst_28 = arith.constant dense<0.000000e+00> : vector<2x16x16xf32>
    %82 = tpu.matmul %81, %69, %cst_28 {dimension_numbers = #tpu.dot_dimension_numbers<[2], [1], [1], [2], [0, 0, 0, 1, 1, 2], [0], [0]>} : vector<2x16x16xf32>, vector<2x16x16xf32>, vector<2x16x16xf32> -> vector<2x16x16xf32>
    "tpu.trace_stop"() : () -> ()
    %83 = vector.extract_strided_slice %46 {offsets = [0, 0, 32], sizes = [2, 16, 16], strides = [1, 1, 1]} : vector<2x16x192xf32> to vector<2x16x16xf32>
    %cst_29 = arith.constant 2.500000e-01 : f32
    %84 = vector.broadcast %cst_29 : f32 to vector<2x16x16xf32>
    %85 = arith.mulf %83, %84 : vector<2x16x16xf32>
    %86 = vector.extract_strided_slice %46 {offsets = [0, 0, 96], sizes = [2, 16, 16], strides = [1, 1, 1]} : vector<2x16x192xf32> to vector<2x16x16xf32>
    %87 = vector.extract_strided_slice %46 {offsets = [0, 0, 160], sizes = [2, 16, 16], strides = [1, 1, 1]} : vector<2x16x192xf32> to vector<2x16x16xf32>
    "tpu.trace_start"() <{level = 10 : i32, message = "bqd,bkd->bqk"}> : () -> ()
    %cst_30 = arith.constant dense<0.000000e+00> : vector<2x16x16xf32>
    %88 = tpu.matmul %85, %86, %cst_30 {dimension_numbers = #tpu.dot_dimension_numbers<[2], [2], [1], [1], [0, 0, 0, 1, 1, 1], [0], [0]>} : vector<2x16x16xf32>, vector<2x16x16xf32>, vector<2x16x16xf32> -> vector<2x16x16xf32>
    "tpu.trace_stop"() : () -> ()
    %89 = vector.broadcast %11 : vector<1x16x16xf32> to vector<2x16x16xf32>
    %90 = arith.addf %88, %89 : vector<2x16x16xf32>
    %cst_31 = arith.constant dense<0xFF800000> : vector<2x16xf32>
    %91 = vector.multi_reduction <maximumf>, %90, %cst_31 [2] : vector<2x16x16xf32> to vector<2x16xf32>
    %92 = vector.shape_cast %91 : vector<2x16xf32> to vector<2x16x1xf32>
    %93 = vector.broadcast %92 : vector<2x16x1xf32> to vector<2x16x16xf32>
    %94 = arith.subf %90, %93 : vector<2x16x16xf32>
    %95 = math.exp %94 : vector<2x16x16xf32>
    %cst_32 = arith.constant dense<0.000000e+00> : vector<2x16xf32>
    %96 = vector.multi_reduction <add>, %95, %cst_32 [2] : vector<2x16x16xf32> to vector<2x16xf32>
    %97 = vector.shape_cast %96 : vector<2x16xf32> to vector<2x16x1xf32>
    %98 = vector.broadcast %97 : vector<2x16x1xf32> to vector<2x16x16xf32>
    %99 = arith.divf %95, %98 : vector<2x16x16xf32>
    "tpu.trace_start"() <{level = 10 : i32, message = "bqk,bkd->bqd"}> : () -> ()
    %cst_33 = arith.constant dense<0.000000e+00> : vector<2x16x16xf32>
    %100 = tpu.matmul %99, %87, %cst_33 {dimension_numbers = #tpu.dot_dimension_numbers<[2], [1], [1], [2], [0, 0, 0, 1, 1, 2], [0], [0]>} : vector<2x16x16xf32>, vector<2x16x16xf32>, vector<2x16x16xf32> -> vector<2x16x16xf32>
    "tpu.trace_stop"() : () -> ()
    %101 = vector.extract_strided_slice %46 {offsets = [0, 0, 48], sizes = [2, 16, 16], strides = [1, 1, 1]} : vector<2x16x192xf32> to vector<2x16x16xf32>
    %cst_34 = arith.constant 2.500000e-01 : f32
    %102 = vector.broadcast %cst_34 : f32 to vector<2x16x16xf32>
    %103 = arith.mulf %101, %102 : vector<2x16x16xf32>
    %104 = vector.extract_strided_slice %46 {offsets = [0, 0, 112], sizes = [2, 16, 16], strides = [1, 1, 1]} : vector<2x16x192xf32> to vector<2x16x16xf32>
    %105 = vector.extract_strided_slice %46 {offsets = [0, 0, 176], sizes = [2, 16, 16], strides = [1, 1, 1]} : vector<2x16x192xf32> to vector<2x16x16xf32>
    "tpu.trace_start"() <{level = 10 : i32, message = "bqd,bkd->bqk"}> : () -> ()
    %cst_35 = arith.constant dense<0.000000e+00> : vector<2x16x16xf32>
    %106 = tpu.matmul %103, %104, %cst_35 {dimension_numbers = #tpu.dot_dimension_numbers<[2], [2], [1], [1], [0, 0, 0, 1, 1, 1], [0], [0]>} : vector<2x16x16xf32>, vector<2x16x16xf32>, vector<2x16x16xf32> -> vector<2x16x16xf32>
    "tpu.trace_stop"() : () -> ()
    %107 = vector.broadcast %11 : vector<1x16x16xf32> to vector<2x16x16xf32>
    %108 = arith.addf %106, %107 : vector<2x16x16xf32>
    %cst_36 = arith.constant dense<0xFF800000> : vector<2x16xf32>
    %109 = vector.multi_reduction <maximumf>, %108, %cst_36 [2] : vector<2x16x16xf32> to vector<2x16xf32>
    %110 = vector.shape_cast %109 : vector<2x16xf32> to vector<2x16x1xf32>
    %111 = vector.broadcast %110 : vector<2x16x1xf32> to vector<2x16x16xf32>
    %112 = arith.subf %108, %111 : vector<2x16x16xf32>
    %113 = math.exp %112 : vector<2x16x16xf32>
    %cst_37 = arith.constant dense<0.000000e+00> : vector<2x16xf32>
    %114 = vector.multi_reduction <add>, %113, %cst_37 [2] : vector<2x16x16xf32> to vector<2x16xf32>
    %115 = vector.shape_cast %114 : vector<2x16xf32> to vector<2x16x1xf32>
    %116 = vector.broadcast %115 : vector<2x16x1xf32> to vector<2x16x16xf32>
    %117 = arith.divf %113, %116 : vector<2x16x16xf32>
    "tpu.trace_start"() <{level = 10 : i32, message = "bqk,bkd->bqd"}> : () -> ()
    %cst_38 = arith.constant dense<0.000000e+00> : vector<2x16x16xf32>
    %118 = tpu.matmul %117, %105, %cst_38 {dimension_numbers = #tpu.dot_dimension_numbers<[2], [1], [1], [2], [0, 0, 0, 1, 1, 2], [0], [0]>} : vector<2x16x16xf32>, vector<2x16x16xf32>, vector<2x16x16xf32> -> vector<2x16x16xf32>
    "tpu.trace_stop"() : () -> ()
    %119 = tpu.concatenate %64, %82, %100, %118 in 2 : vector<2x16x16xf32>, vector<2x16x16xf32>, vector<2x16x16xf32>, vector<2x16x16xf32> -> vector<2x16x64xf32>
    %120 = vector.shape_cast %119 : vector<2x16x64xf32> to vector<32x64xf32>
    %c0_39 = arith.constant 0 : index
    %c0_40 = arith.constant 0 : index
    %121 = vector.load %arg7[%c0_39, %c0_40] : memref<64x64xf32, #tpu.memory_space<vmem>>, vector<64x64xf32>
    %cst_41 = arith.constant dense<0.000000e+00> : vector<32x64xf32>
    %122 = tpu.matmul %120, %121, %cst_41 {dimension_numbers = #tpu.dot_dimension_numbers<[1], [0], [0], [1], [0, 0, 1, 1], [], []>} : vector<32x64xf32>, vector<64x64xf32>, vector<32x64xf32> -> vector<32x64xf32>
    %c0_42 = arith.constant 0 : index
    %c0_43 = arith.constant 0 : index
    %123 = vector.load %arg8[%c0_42, %c0_43] : memref<1x64xf32, #tpu.memory_space<vmem>>, vector<1x64xf32>
    %124 = vector.shape_cast %123 : vector<1x64xf32> to vector<64xf32>
    %125 = vector.shape_cast %124 : vector<64xf32> to vector<1x64xf32>
    %126 = vector.broadcast %125 : vector<1x64xf32> to vector<32x64xf32>
    %127 = arith.addf %122, %126 : vector<32x64xf32>
    %128 = vector.shape_cast %127 : vector<32x64xf32> to vector<2x16x64xf32>
    %129 = arith.addf %4, %128 : vector<2x16x64xf32>
    %c0_44 = arith.constant 0 : index
    %c0_45 = arith.constant 0 : index
    %130 = vector.load %arg9[%c0_44, %c0_45] : memref<1x64xf32, #tpu.memory_space<vmem>>, vector<1x64xf32>
    %131 = vector.shape_cast %130 : vector<1x64xf32> to vector<64xf32>
    %c0_46 = arith.constant 0 : index
    %c0_47 = arith.constant 0 : index
    %132 = vector.load %arg10[%c0_46, %c0_47] : memref<1x64xf32, #tpu.memory_space<vmem>>, vector<1x64xf32>
    %133 = vector.shape_cast %132 : vector<1x64xf32> to vector<64xf32>
    %cst_48 = arith.constant dense<0.000000e+00> : vector<2x16xf32>
    %134 = vector.multi_reduction <add>, %129, %cst_48 [2] : vector<2x16x64xf32> to vector<2x16xf32>
    %135 = vector.shape_cast %134 : vector<2x16xf32> to vector<2x16x1xf32>
    %cst_49 = arith.constant 6.400000e+01 : f32
    %136 = vector.broadcast %cst_49 : f32 to vector<2x16x1xf32>
    %137 = arith.divf %135, %136 : vector<2x16x1xf32>
    %138 = vector.broadcast %137 : vector<2x16x1xf32> to vector<2x16x64xf32>
    %139 = arith.subf %129, %138 : vector<2x16x64xf32>
    %140 = arith.mulf %139, %139 : vector<2x16x64xf32>
    %cst_50 = arith.constant dense<0.000000e+00> : vector<2x16xf32>
    %141 = vector.multi_reduction <add>, %140, %cst_50 [2] : vector<2x16x64xf32> to vector<2x16xf32>
    %142 = vector.shape_cast %141 : vector<2x16xf32> to vector<2x16x1xf32>
    %cst_51 = arith.constant 6.400000e+01 : f32
    %143 = vector.broadcast %cst_51 : f32 to vector<2x16x1xf32>
    %144 = arith.divf %142, %143 : vector<2x16x1xf32>
    %cst_52 = arith.constant 9.99999974E-6 : f32
    %145 = vector.broadcast %cst_52 : f32 to vector<2x16x1xf32>
    %146 = arith.addf %144, %145 : vector<2x16x1xf32>
    %147 = math.rsqrt %146 : vector<2x16x1xf32>
    %148 = vector.broadcast %147 : vector<2x16x1xf32> to vector<2x16x64xf32>
    %149 = arith.mulf %139, %148 : vector<2x16x64xf32>
    %150 = vector.shape_cast %131 : vector<64xf32> to vector<1x1x64xf32>
    %151 = vector.broadcast %150 : vector<1x1x64xf32> to vector<2x16x64xf32>
    %152 = arith.mulf %149, %151 : vector<2x16x64xf32>
    %153 = vector.shape_cast %133 : vector<64xf32> to vector<1x1x64xf32>
    %154 = vector.broadcast %153 : vector<1x1x64xf32> to vector<2x16x64xf32>
    %155 = arith.addf %152, %154 : vector<2x16x64xf32>
    %156 = vector.shape_cast %155 : vector<2x16x64xf32> to vector<32x64xf32>
    %c0_53 = arith.constant 0 : index
    %c0_54 = arith.constant 0 : index
    %157 = vector.load %arg11[%c0_53, %c0_54] : memref<64x256xf32, #tpu.memory_space<vmem>>, vector<64x256xf32>
    %cst_55 = arith.constant dense<0.000000e+00> : vector<32x256xf32>
    %158 = tpu.matmul %156, %157, %cst_55 {dimension_numbers = #tpu.dot_dimension_numbers<[1], [0], [0], [1], [0, 0, 1, 1], [], []>} : vector<32x64xf32>, vector<64x256xf32>, vector<32x256xf32> -> vector<32x256xf32>
    %c0_56 = arith.constant 0 : index
    %c0_57 = arith.constant 0 : index
    %159 = vector.load %arg12[%c0_56, %c0_57] : memref<1x256xf32, #tpu.memory_space<vmem>>, vector<1x256xf32>
    %160 = vector.shape_cast %159 : vector<1x256xf32> to vector<256xf32>
    %161 = vector.shape_cast %160 : vector<256xf32> to vector<1x256xf32>
    %162 = vector.broadcast %161 : vector<1x256xf32> to vector<32x256xf32>
    %163 = arith.addf %158, %162 : vector<32x256xf32>
    %cst_58 = arith.constant -1.702000e+00 : f32
    %164 = vector.broadcast %cst_58 : f32 to vector<32x256xf32>
    %165 = arith.mulf %164, %163 : vector<32x256xf32>
    %166 = math.exp %165 : vector<32x256xf32>
    %cst_59 = arith.constant 1.000000e+00 : f32
    %167 = vector.broadcast %cst_59 : f32 to vector<32x256xf32>
    %168 = arith.addf %167, %166 : vector<32x256xf32>
    %cst_60 = arith.constant 1.000000e+00 : f32
    %169 = vector.broadcast %cst_60 : f32 to vector<32x256xf32>
    %170 = arith.divf %169, %168 : vector<32x256xf32>
    %171 = arith.mulf %163, %170 : vector<32x256xf32>
    %c0_61 = arith.constant 0 : index
    %c0_62 = arith.constant 0 : index
    %172 = vector.load %arg13[%c0_61, %c0_62] : memref<256x64xf32, #tpu.memory_space<vmem>>, vector<256x64xf32>
    %cst_63 = arith.constant dense<0.000000e+00> : vector<32x64xf32>
    %173 = tpu.matmul %171, %172, %cst_63 {dimension_numbers = #tpu.dot_dimension_numbers<[1], [0], [0], [1], [0, 0, 1, 1], [], []>} : vector<32x256xf32>, vector<256x64xf32>, vector<32x64xf32> -> vector<32x64xf32>
    %c0_64 = arith.constant 0 : index
    %c0_65 = arith.constant 0 : index
    %174 = vector.load %arg14[%c0_64, %c0_65] : memref<1x64xf32, #tpu.memory_space<vmem>>, vector<1x64xf32>
    %175 = vector.shape_cast %174 : vector<1x64xf32> to vector<64xf32>
    %176 = vector.shape_cast %175 : vector<64xf32> to vector<1x64xf32>
    %177 = vector.broadcast %176 : vector<1x64xf32> to vector<32x64xf32>
    %178 = arith.addf %173, %177 : vector<32x64xf32>
    %179 = vector.shape_cast %178 : vector<32x64xf32> to vector<2x16x64xf32>
    %180 = arith.addf %129, %179 : vector<2x16x64xf32>
    %c0_66 = arith.constant 0 : index
    %c0_67 = arith.constant 0 : index
    %c0_68 = arith.constant 0 : index
    %181 = vector.load %arg15[%c0_66, %c0_67, %c0_68] : memref<2x16x64xf32, #tpu.memory_space<vmem>>, vector<2x16x64xf32>
    tpu.vector_store %arg15[%c0_66, %c0_67, %c0_68], %180 {strides = array<i32>} : memref<2x16x64xf32, #tpu.memory_space<vmem>>, vector<2x16x64xf32>,
    return
  }
  func.func @transform_0(%arg0: i32) -> (i32, i32, i32) {
    %c0_i32 = arith.constant 0 : i32
    %c0_i32_0 = arith.constant 0 : i32
    %c0_i32_1 = arith.constant 0 : i32
    return %arg0, %c0_i32, %c0_i32_0 : i32, i32, i32
  }
  func.func @transform_1(%arg0: i32) -> (i32, i32) {
    %c0_i32 = arith.constant 0 : i32
    %c0_i32_0 = arith.constant 0 : i32
    %c0_i32_1 = arith.constant 0 : i32
    return %c0_i32, %c0_i32_0 : i32, i32
  }
  func.func @transform_2(%arg0: i32) -> (i32, i32) {
    %c0_i32 = arith.constant 0 : i32
    %c0_i32_0 = arith.constant 0 : i32
    %c0_i32_1 = arith.constant 0 : i32
    return %c0_i32, %c0_i32_0 : i32, i32
  }
  func.func @transform_3(%arg0: i32) -> (i32, i32) {
    %c0_i32 = arith.constant 0 : i32
    %c0_i32_0 = arith.constant 0 : i32
    %c0_i32_1 = arith.constant 0 : i32
    return %c0_i32, %c0_i32_0 : i32, i32
  }
  func.func @transform_4(%arg0: i32) -> (i32, i32) {
    %c0_i32 = arith.constant 0 : i32
    %c0_i32_0 = arith.constant 0 : i32
    %c0_i32_1 = arith.constant 0 : i32
    return %c0_i32, %c0_i32_0 : i32, i32
  }
  func.func @transform_5(%arg0: i32) -> (i32, i32) {
    %c0_i32 = arith.constant 0 : i32
    %c0_i32_0 = arith.constant 0 : i32
    %c0_i32_1 = arith.constant 0 : i32
    return %c0_i32, %c0_i32_0 : i32, i32
  }
  func.func @transform_6(%arg0: i32) -> (i32, i32) {
    %c0_i32 = arith.constant 0 : i32
    %c0_i32_0 = arith.constant 0 : i32
    %c0_i32_1 = arith.constant 0 : i32
    return %c0_i32, %c0_i32_0 : i32, i32
  }
  func.func @transform_7(%arg0: i32) -> (i32, i32) {
    %c0_i32 = arith.constant 0 : i32
    %c0_i32_0 = arith.constant 0 : i32
    %c0_i32_1 = arith.constant 0 : i32
    return %c0_i32, %c0_i32_0 : i32, i32
  }
  func.func @transform_8(%arg0: i32) -> (i32, i32) {
    %c0_i32 = arith.constant 0 : i32
    %c0_i32_0 = arith.constant 0 : i32
    %c0_i32_1 = arith.constant 0 : i32
    return %c0_i32, %c0_i32_0 : i32, i32
  }
  func.func @transform_9(%arg0: i32) -> (i32, i32) {
    %c0_i32 = arith.constant 0 : i32
    %c0_i32_0 = arith.constant 0 : i32
    %c0_i32_1 = arith.constant 0 : i32
    return %c0_i32, %c0_i32_0 : i32, i32
  }
  func.func @transform_10(%arg0: i32) -> (i32, i32) {
    %c0_i32 = arith.constant 0 : i32
    %c0_i32_0 = arith.constant 0 : i32
    %c0_i32_1 = arith.constant 0 : i32
    return %c0_i32, %c0_i32_0 : i32, i32
  }
  func.func @transform_11(%arg0: i32) -> (i32, i32) {
    %c0_i32 = arith.constant 0 : i32
    %c0_i32_0 = arith.constant 0 : i32
    %c0_i32_1 = arith.constant 0 : i32
    return %c0_i32, %c0_i32_0 : i32, i32
  }
  func.func @transform_12(%arg0: i32) -> (i32, i32) {
    %c0_i32 = arith.constant 0 : i32
    %c0_i32_0 = arith.constant 0 : i32
    %c0_i32_1 = arith.constant 0 : i32
    return %c0_i32, %c0_i32_0 : i32, i32
  }
  func.func @transform_13(%arg0: i32) -> (i32, i32) {
    %c0_i32 = arith.constant 0 : i32
    %c0_i32_0 = arith.constant 0 : i32
    %c0_i32_1 = arith.constant 0 : i32
    return %c0_i32, %c0_i32_0 : i32, i32
  }
  func.func @transform_14(%arg0: i32) -> (i32, i32, i32) {
    %c0_i32 = arith.constant 0 : i32
    %c0_i32_0 = arith.constant 0 : i32
    %c0_i32_1 = arith.constant 0 : i32
    return %arg0, %c0_i32, %c0_i32_0 : i32, i32, i32
  }
}

</mosaic_0001>

<bundles_post_ra>
// kernel: tpu_custom_call.1
= control target key start
LH: loop header
LB: loop body
LE: loop exit
PB: predicated region body
PF: predicated region fallthrough
CT: control target
= control target key end

     0   :  { %s4209_s0 = inlined_call_operand.vmem [shape: f32[4,16,64], index: 0, kind: input, shape index: {}]   ;;  %s4210_s1 = inlined_call_operand.hbm [shape: f32[16,64], index: 1, kind: input, shape index: {}]   ;;  %s4211_s2 = inlined_call_operand.hbm [shape: f32[1,64], index: 2, kind: input, shape index: {}]   ;;  %s4212_s3 = inlined_call_operand.hbm [shape: f32[1,64], index: 3, kind: input, shape index: {}]   ;;  %s4213_s4 = inlined_call_operand.vmem [shape: f32[64,192], index: 4, kind: input, shape index: {}]   ;;  %s4214_s5 = inlined_call_operand.vmem [shape: f32[1,192], index: 5, kind: input, shape index: {}]   ;;  %s4215_s6 = inlined_call_operand.vmem [shape: f32[64,64], index: 6, kind: input, shape index: {}]   ;;  %s4216_s7 = inlined_call_operand.hbm [shape: f32[1,64], index: 7, kind: input, shape index: {}]   ;;  %s4217_s8 = inlined_call_operand.hbm [shape: f32[1,64], index: 8, kind: input, shape index: {}]   ;;  %s4218_s9 = inlined_call_operand.hbm [shape: f32[1,64], index: 9, kind: input, shape index: {}]   ;;  %s4219_s10 = inlined_call_operand.vmem [shape: f32[64,256], index: 10, kind: input, shape index: {}]   ;;  %s4220_s11 = inlined_call_operand.vmem [shape: f32[1,256], index: 11, kind: input, shape index: {}]   ;;  %s4221_s12 = inlined_call_operand.vmem [shape: f32[256,64], index: 12, kind: input, shape index: {}]   ;;  %s4222_s13 = inlined_call_operand.vmem [shape: f32[1,64], index: 13, kind: input, shape index: {}]   ;;  %s4223_s14 = inlined_call_operand.hbm [shape: f32[4,16,64], index: 14, kind: output, shape index: {}]  }
   0x1   :  { %4232 = sst [smem:[#allocation26_spill]] %s4210_s1 }
   0x2   :  { %4233 = sst [smem:[#allocation27_spill]] %s4211_s2 }
   0x3   :  { %4234 = sst [smem:[#allocation28_spill]] %s4216_s7 }
   0x4   :  { %19 = vsyncpa [#allocation3], 0 }
   0x5   :  { %20 = vsyncpa [#allocation6], 0 }
   0x6   :  { %21 = vsyncpa [#allocation9], 0 }
   0x7   :  { %22 = vsyncpa [#allocation12], 0 }
   0x8   :  { %23 = vsyncpa [#allocation4], 0 }
   0x9   :  { %25 = vsyncpa [#allocation4 + $0x1], 0  ;;  %s3196_s29 = smov 0   ;;  %s3198_s30 = smov 0  }
   0xa   :  { %s3200_s15 = smov 0   ;;  %s3202_s16 = smov 0  }
   0xb LB: > { %4235 = sst [smem:[#allocation19_spill]] %s3088_s29  ;;  %s3217_s17 = sadd.s32 4294967295, %s3100_s16   ;;  %s3100_s16 = sphi %s3202_s16, %s4259_s16   ;;  %s3096_s15 = sphi %s3200_s15, %s4261_s15   ;;  %s3092_s30 = sphi %s3198_s30, %s4263_s30   ;;  %s3088_s29 = sphi %s3196_s29, %s4262_s29  }
   0xc   : > { %4236 = sst [smem:[#allocation20_spill]] %s3096_s15  ;;  %s2474_s18 = sadd.s32 4294967294, %s3100_s16  }
   0xd   : > { %4237 = sst [smem:[#allocation21_spill]] %s3100_s16  ;;  %s3221_s19 = sadd.s32 1, %s3100_s16  }
   0xe   : > { %4238 = sst [smem:[#allocation22_spill]] %s3221_s19  ;;  %s337_s20 = sadd.s32 1, %s3096_s15 }
   0xf   : > { %s334_s21 = ssub.s32 %s3100_s16, %s3221_s19  ;;  %p347_p0 = scmp.ne.s32.totalorder %s3096_s15, %s3092_s30 }
  0x10   : > { %p335_p1 = scmp.eq.s32.totalorder %s334_s21, 0  ;;  %p348_p2 = scmp.eq.s32.totalorder %s3217_s17, 1 }
  0x11   : > { %p353_p3 = scmp.ne.s32.totalorder %s3092_s30, %s3088_s29  ;;  %p354_p4 = scmp.eq.s32.totalorder %s2474_s18, 1 }
  0x12   : > { %s3232_s22 = scalar_select %p335_p1, %s3096_s15, %s337_s20  }
  0x13   : > { %p3234_p5 = por %p348_p2, %p347_p0  ;;  %p3238_p6 = por %p354_p4, %p353_p3 }
  0x14   : > { %4239 = sst [smem:[#allocation23_spill]] %s3232_s22  ;;  %p2475_p7 = scmp.ge.s32.totalorder %s3100_s16, 1 }
  0x15   : > { %s4240_s23 = scalar_select %p3234_p5, 1, 0 }
  0x16   : > { %s4242_s24 = scalar_select %p3238_p6, 1, 0 }
  0x17   : > { %4241 = sst [smem:[#allocation24_spill]] %s4240_s23  ;;  %p361_p8 = scmp.lt.s32.totalorder %s3100_s16, 3 }
  0x18   : > { %4243 = sst [smem:[#allocation25_spill]] %s4242_s24  ;;  %p2628_p9 = scmp.eq.s32.totalorder %s3217_s17, 0 }
  0x19   : > { %p3245_p10 = pnand %p2475_p7, %p361_p8  ;;  %s4245_s2 = sld [smem:[#allocation27_spill]] }
  0x1a   : > { %s3102_s18 = smov [#allocation5]   ;;  %s4246_s7 = sld [smem:[#allocation28_spill]] }
  0x1b   : > { %p2605_p11 = pneg %p3245_p10  ;;  %s389_s20 = sshll.u32 %s3102_s18, 4  ;;  %s390_s20 = int_to_ptr.vmem [resolvable:$true] %s389_s20 }
  0x1c   : > { %s4248_s1 = sld [smem:[#allocation26_spill]]  ;;  %s3103_s24 = smov [#allocation8]  }
  0x1d   : > { %p3259_p12 = pnand %p2628_p9, %p2605_p11  ;;  %s422_s18 = sshll.u32 %s3103_s24, 4  ;;  %s423_s18 = int_to_ptr.vmem [resolvable:$true] %s422_s18 }
  0x1e   : > { %s3104_s22 = smov [#allocation2]   ;;  %s399_s16 = sshll.u32 %s4212_s3, 4  ;;  %s400_s16 = int_to_ptr.hbm [resolvable:$true] %s399_s16 }
  0x1f   : > { %s387_s28 = sshll.u32 %s4245_s2, 4  ;;  %s374_s21 = sshll.u32 %s3104_s22, 4  ;;  %s388_s28 = int_to_ptr.hbm [resolvable:$true] %s387_s28  ;;  %s375_s21 = int_to_ptr.vmem [resolvable:$true] %s374_s21 }
  0x20   : > { %s420_s15 = sshll.u32 %s4246_s7, 4  ;;  %s3105_s23 = smov 128   ;;  %s421_s15 = int_to_ptr.hbm [resolvable:$true] %s420_s15 }
  0x21   : > { %2611 = dma.hbm_to_vmem [thread:$0]  (!%p3259_p12), %s388_s28, 16, %s390_s20, [#allocation6]  }
  0x22   : > { %s372_s2 = sshll.u32 %s4248_s1, 4  ;;  %s3106_s26 = smov 8   ;;  %s373_s2 = int_to_ptr.hbm [resolvable:$true] %s372_s2 }
  0x23   : > { %2617 = dma.hbm_to_vmem [thread:$0]  (!%p3259_p12), %s421_s15, 16, %s423_s18, [#allocation9]  }
  0x24   : > { %2608 = dma.hbm_to_vmem [thread:$0]  (!%p3259_p12), %s373_s2, 256, %s375_s21, [#allocation3], %s3105_s23, %s3105_s23, %s3106_s26  }
  0x25   : > { %s3107_s24 = smov [#allocation7]   ;;  %s432_s15 = sshll.u32 %s4217_s8, 4  ;;  %s433_s15 = int_to_ptr.hbm [resolvable:$true] %s432_s15 }
  0x26   : > { %s401_s28 = sshll.u32 %s3107_s24, 4  ;;  %s444_s29 = sshll.u32 %s4218_s9, 4  ;;  %s402_s28 = int_to_ptr.vmem [resolvable:$true] %s401_s28  ;;  %s445_s29 = int_to_ptr.hbm [resolvable:$true] %s444_s29 }
  0x27   : > { %2614 = dma.hbm_to_vmem [thread:$0]  (!%p3259_p12), %s400_s16, 16, %s402_s28, [#allocation6]  }
  0x28   : > { %s3108_s22 = smov [#allocation10]   ;;  %s3109_s2 = smov [#allocation11]  }
  0x29   : > { %s434_s1 = sshll.u32 %s3108_s22, 4  ;;  %s446_s23 = sshll.u32 %s3109_s2, 4  ;;  %s435_s1 = int_to_ptr.vmem [resolvable:$true] %s434_s1  ;;  %s447_s23 = int_to_ptr.vmem [resolvable:$true] %s446_s23 }
  0x2a   : > { %2620 = dma.hbm_to_vmem [thread:$0]  (!%p3259_p12), %s433_s15, 16, %s435_s1, [#allocation9]  }
  0x2b   : > { %2623 = dma.hbm_to_vmem [thread:$0]  (!%p3259_p12), %s445_s29, 16, %s447_s23, [#allocation12]  }
  0x2c   : > { %481 = sbr.rel (%p3245_p10) target bundleno = 2515 (0x9d3), region = 76 }
  0x31   : > { %3067 = dma.done.wait (%p2628_p9), [#allocation3], 256  }
  0x32   : > { %3069 = vsyncadd (%p2628_p9), [#allocation3], 4294967040 }
  0x33   : > { %3071 = dma.done.wait (%p2628_p9), [#allocation6], 32  }
  0x34   : > { %3073 = vsyncadd (%p2628_p9), [#allocation6], 4294967264 }
  0x35   : > { %3075 = dma.done.wait (%p2628_p9), [#allocation9], 32  }
  0x36   : > { %3077 = vsyncadd (%p2628_p9), [#allocation9], 4294967264 }
  0x37   : > { %3079 = dma.done.wait (%p2628_p9), [#allocation12], 16  }
  0x38   : > { %3081 = vsyncadd (%p2628_p9), [#allocation12], 4294967280  ;;  %s2491_s1 = sshll.u32 %s3217_s17, 1  ;;  %v566_v1 = vld [vmem:[#allocation2] sm:$0xff]  ;;  %vm583_vm0 = vcmask 523264   ;;  %v567_v6 = vld [vmem:[#allocation2 + $0x8] sm:$0xff] }
  0x39   : > { %p555_p13 = scmp.lt.s32.totalorder %s2491_s1, 3  ;;  %v3110_v14 = vmov 64.0   ;;  %v707_v41 = vld [vmem:[%s4213_s4 + $0x70] sm:$0xff]  ;;  %v705_v42 = vld [vmem:[%s4213_s4 + $0x60] sm:$0xff]  ;;  %v708_v46 = vld [vmem:[%s4213_s4 + $0x78] sm:$0xff]  ;;  %s3111_s26 = smov 64  }
  0x3a   : > { %2728 = vrcp.f32 %v3110_v14  ;;  %735 = vmatpush.msra.mxu0 %v707_v41  ;;  %v703_v43 = vld [vmem:[%s4213_s4 + $0x50] sm:$0xff]  ;;  %v701_v44 = vld [vmem:[%s4213_s4 + $0x40] sm:$0xff]  ;;  %2571 = vmatpush.msra.mxu1 %v708_v46  ;;  %v706_v48 = vld [vmem:[%s4213_s4 + $0x68] sm:$0xff]  ;;  %s3112_s24 = smov 48   ;;  %s3113_s28 = smov 112   ;;  %vm795_vm14 = vcmask 130048  }
  0x3b   : > { %s4265_s1 = smov (!%p555_p13, %s2491_s1), 3  ;;  %v699_v45 = vld [vmem:[%s4213_s4 + $0x30] sm:$0xff]  ;;  %v697_v47 = vld [vmem:[%s4213_s4 + $0x20] sm:$0xff]  ;;  %v704_v50 = vld [vmem:[%s4213_s4 + $0x58] sm:$0xff]  ;;  %s3115_s20 = smov 32  }
  0x3c   : > { %s2568_s16 = sshll.u32 %s4265_s1, 4  ;;  %736 = vmatpush.msra.mxu0 %v705_v42  ;;  %2572 = vmatpush.msra.mxu1 %v706_v48  ;;  %v695_v49 = vld [vmem:[%s4213_s4 + $0x10] sm:$0xff]  ;;  %v693_v51 = vld [vmem:[%s4213_s4] sm:$0xff]  ;;  %v702_v52 = vld [vmem:[%s4213_s4 + $0x48] sm:$0xff]  ;;  %s3116_s27 = smov 96  }
  0x3d   : > { %s559_s21 = scalar_lea.vmem %s4209_s0, %s2568_s16  ;;  %v700_v53 = vld [vmem:[%s4213_s4 + $0x38] sm:$0xff]  ;;  %v698_v54 = vld [vmem:[%s4213_s4 + $0x28] sm:$0xff]  ;;  %s3117_s15 = smov 16  }
  0x3e   : > { %v564_v0 = vld [vmem:[%s559_s21 + $0x10] sm:$0xff]  ;;  %v562_v2 = vld [vmem:[%s559_s21] sm:$0xff]  ;;  %v565_v5 = vld [vmem:[%s559_s21 + $0x18] sm:$0xff]  ;;  %737 = vmatpush.msra.mxu0 %v703_v43  ;;  %2573 = vmatpush.msra.mxu1 %v704_v50  ;;  %s3118_s18 = smov 80   ;;  %s2570_s7 = sshll.u32 %s3217_s17, 5 }
  0x3f   : > { %v3309_v3 = vadd.f32 %v566_v1, %v564_v0  ;;  %v3311_v4 = vadd.f32 %v566_v1, %v562_v2  ;;  %v563_v7 = vld [vmem:[%s559_s21 + $0x8] sm:$0xff]  ;;  %v3317_v10 = vadd.f32 %v567_v6, %v565_v5  ;;  %v696_v57 = vld [vmem:[%s4213_s4 + $0x18] sm:$0xff]  ;;  %s2348_s2 = scalar_lea.hbm %s4223_s14, %s2570_s7 }
  0x40   : > { %v3319_v11 = vadd.f32 %v567_v6, %v563_v7  ;;  %v2729_v15 = vpop.eup %2728  ;;  %738 = vmatpush.msra.mxu0 %v701_v44  ;;  %2574 = vmatpush.msra.mxu1 %v702_v52  ;;  %v694_v60 = vld [vmem:[%s4213_s4 + $0x8] sm:$0xff]  ;;  %s2351_s16 = sshll.u32 %s2348_s2, 4  ;;  %s2352_s16 = int_to_ptr.hbm [resolvable:$true] %s2351_s16 }
  0x41   : > { %v590_v8 = vsel %vm583_vm0, %v3309_v3, 0.0  ;;  %v584_v9 = vsel %vm583_vm0, %v3311_v4, 0.0  ;;  %v593_v12 = vsel %vm583_vm0, %v3317_v10, 0.0  ;;  %v597_v16 = vmul.f32 64.0, %v2729_v15  ;;  %s3036_s19 = sshra.s32 %s2352_s16, 4  ;;  %s3037_s19 = int_to_ptr.hbm [resolvable:$true] %s3036_s19 }
  0x42   : > { %591 = vadd.xlane.f32.xlu1 %v590_v8  ;;  %585 = vadd.xlane.f32.xlu0 %v584_v9  ;;  %v587_v13 = vsel %vm583_vm0, %v3319_v11, 0.0  ;;  %vm601_vm1 = vweird.f32 %v2729_v15  ;;  %s3038_s25 = scalar_lea.hbm %s3037_s19, 32  ;;  %p3043_p3 = scmp.lt.s32.totalorder %s3037_s19, %s4223_s14 }
  0x43   : > { %v598_v17 = vsub.f32 1.0, %v597_v16  ;;  %739 = vmatpush.msra.mxu0 %v699_v45  ;;  %2575 = vmatpush.msra.mxu1 %v700_v53  ;;  %p3039_p0 = scmp.ne.s32.totalorder %s3037_s19, %s3038_s25 }
  0x45   : > { %v599_v18 = vmul.f32 %v2729_v15, %v598_v17  ;;  %740 = vmatpush.msra.mxu0 %v697_v47  ;;  %2576 = vmatpush.msra.mxu1 %v698_v54  ;;  %p3040_p1 = pnand %p3039_p0, %p3234_p5 }
  0x47   : > { %v600_v19 = vadd.f32 %v2729_v15, %v599_v18  ;;  %741 = vmatpush.msra.mxu0 %v695_v49  ;;  %2577 = vmatpush.msra.mxu1 %v696_v57  ;;  %p3041_p2 = pneg %p3040_p1 }
  0x49   : > { %v3325_v20 = vsel %vm601_vm1, %v2729_v15, %v600_v19  ;;  %742 = vmatpush.msra.mxu0 %v693_v51  ;;  %2578 = vmatpush.msra.mxu1 %v694_v60 }
  0x4a   : > { %594 = vadd.xlane.f32.xlu1 %v593_v12  ;;  %588 = vadd.xlane.f32.xlu0 %v587_v13 }
  0x4b   : > { %764 = vmatpush.msrb.mxu0 %v708_v46 }
  0x4d   : > { %765 = vmatpush.msrb.mxu0 %v706_v48 }
  0x4f   : > { %766 = vmatpush.msrb.mxu0 %v704_v50 }
  0x51   : > { %767 = vmatpush.msrb.mxu0 %v702_v52 }
  0x53   : > { %768 = vmatpush.msrb.mxu0 %v700_v53 }
  0x55   : > { %769 = vmatpush.msrb.mxu0 %v698_v54 }
  0x57   : > { %770 = vmatpush.msrb.mxu0 %v696_v57 }
  0x59   : > { %771 = vmatpush.msrb.mxu0 %v694_v60 }
  0xb5   : > { %v592_v21 = vpop.xlane.xlu1 %591  ;;  %v586_v22 = vpop.xlane.xlu0 %585 }
  0xb6   : > { %v605_v23 = vmul.f32 %v3325_v20, %v592_v21  ;;  %v603_v24 = vmul.f32 %v3325_v20, %v586_v22 }
  0xb8   : > { %v3330_v25 = vsub.f32 %v3309_v3, %v605_v23  ;;  %v3333_v26 = vsub.f32 %v3311_v4, %v603_v24  ;;  %v2722_v24 = vld [vmem:[#allocation5] ss:$0 sm:$0xff] }
  0xba   : > { %v613_v27 = vmul.f32 %v3330_v25, %v3330_v25  ;;  %v611_v28 = vmul.f32 %v3333_v26, %v3333_v26 }
  0xbc   : > { %v621_v29 = vsel %vm583_vm0, %v613_v27, 0.0  ;;  %v615_v30 = vsel %vm583_vm0, %v611_v28, 0.0 }
  0xbd   : > { %v595_v31 = vpop.xlane.xlu1 %594  ;;  %622 = vadd.xlane.f32.xlu0 %v621_v29  ;;  %616 = vadd.xlane.f32.xlu2 %v615_v30  ;;  %v589_v32 = vpop.xlane.xlu0 %588  ;;  %v2723_v30 = vld [vmem:[#allocation7] ss:$0 sm:$0xff] }
  0xbe   : > { %v606_v33 = vmul.f32 %v3325_v20, %v595_v31  ;;  %v604_v34 = vmul.f32 %v3325_v20, %v589_v32 }
  0xc0   : > { %v3344_v35 = vsub.f32 %v3317_v10, %v606_v33  ;;  %v3347_v36 = vsub.f32 %v3319_v11, %v604_v34 }
  0xc2   : > { %v614_v37 = vmul.f32 %v3344_v35, %v3344_v35  ;;  %v612_v38 = vmul.f32 %v3347_v36, %v3347_v36 }
  0xc4   : > { %v624_v39 = vsel %vm583_vm0, %v614_v37, 0.0  ;;  %v618_v40 = vsel %vm583_vm0, %v612_v38, 0.0 }
  0xc5   : > { %625 = vadd.xlane.f32.xlu1 %v624_v39  ;;  %619 = vadd.xlane.f32.xlu2 %v618_v40 }
 0x130   : > { %v617_v55 = vpop.xlane.xlu2 %616  ;;  %v623_v56 = vpop.xlane.xlu0 %622 }
 0x131   : > { %v627_v58 = vmul.f32 %v617_v55, %v3325_v20  ;;  %v629_v59 = vmul.f32 %v623_v56, %v3325_v20 }
 0x133   : > { %v631_v61 = vadd.f32 1e-05, %v627_v58  ;;  %v633_v62 = vadd.f32 1e-05, %v629_v59 }
 0x135   : > { %2730 = vrsqrt.f32 %v631_v61  ;;  %vm641_vm3 = vweird.f32 %v631_v61  ;;  %vm661_vm5 = vweird.f32 %v633_v62 }
 0x136   : > { %2732 = vrsqrt.f32 %v633_v62 }
 0x138   : > { %v626_v63 = vpop.xlane.xlu1 %625  ;;  %v620_v0 = vpop.xlane.xlu2 %619 }
 0x139   : > { %v630_v1 = vmul.f32 %v626_v63, %v3325_v20  ;;  %v628_v2 = vmul.f32 %v620_v0, %v3325_v20 }
 0x13b   : > { %v2731_v5 = vpop.eup %2730  ;;  %v634_v6 = vadd.f32 1e-05, %v630_v1  ;;  %v632_v7 = vadd.f32 1e-05, %v628_v2 }
 0x13c   : > { %v2733_v8 = vpop.eup %2732  ;;  %v636_v9 = vmul.f32 %v2731_v5, %v631_v61  ;;  %vm642_vm2 = vweird.f32 %v2731_v5 }
 0x13d   : > { %v656_v12 = vmul.f32 %v2733_v8, %v633_v62  ;;  %2734 = vrsqrt.f32 %v634_v6  ;;  %vm643_vm4 = vmor %vm641_vm3, %vm642_vm2  ;;  %vm662_vm6 = vweird.f32 %v2733_v8  ;;  %vm651_vm7 = vweird.f32 %v632_v7 }
 0x13e   : > { %v637_v13 = vmul.f32 %v2731_v5, %v636_v9  ;;  %2736 = vrsqrt.f32 %v632_v7  ;;  %vm663_vm9 = vmor %vm661_vm5, %vm662_vm6  ;;  %vm671_vm11 = vweird.f32 %v634_v6 }
 0x13f   : > { %v657_v15 = vmul.f32 %v2733_v8, %v656_v12 }
 0x140   : > { %v638_v14 = vmul.f32 0.5, %v637_v13 }
 0x141   : > { %v658_v21 = vmul.f32 0.5, %v657_v15 }
 0x142   : > { %v639_v16 = vsub.f32 1.5, %v638_v14 }
 0x143   : > { %v2735_v17 = vpop.eup %2734  ;;  %v659_v31 = vsub.f32 1.5, %v658_v21 }
 0x144   : > { %v2737_v18 = vpop.eup %2736  ;;  %v640_v19 = vmul.f32 %v2731_v5, %v639_v16  ;;  %v666_v22 = vmul.f32 %v2735_v17, %v634_v6  ;;  %vm672_vm12 = vweird.f32 %v2735_v17 }
 0x145   : > { %v646_v23 = vmul.f32 %v2737_v18, %v632_v7  ;;  %vm652_vm8 = vweird.f32 %v2737_v18  ;;  %v660_v39 = vmul.f32 %v2733_v8, %v659_v31  ;;  %vm673_vm13 = vmor %vm671_vm11, %vm672_vm12 }
 0x146   : > { %v644_v27 = vsel %vm643_vm4, %v2731_v5, %v640_v19  ;;  %v667_v32 = vmul.f32 %v2735_v17, %v666_v22  ;;  %vm653_vm10 = vmor %vm651_vm7, %vm652_vm8 }
 0x147   : > { %v647_v28 = vmul.f32 %v2737_v18, %v646_v23  ;;  %v675_v29 = vmul.f32 %v644_v27, %v3333_v26  ;;  %v664_v43 = vsel %vm663_vm9, %v2733_v8, %v660_v39  ;;  %v572_v23 = vlaneseq }
 0x148   : > { %v668_v40 = vmul.f32 0.5, %v667_v32  ;;  %v677_v47 = vmul.f32 %v664_v43, %v3330_v25  ;;  %v709_v25 = vld [vmem:[%s4214_s5] sm:$0x3] }
 0x149   : > { %v648_v33 = vmul.f32 0.5, %v647_v28  ;;  %v682_v34 = vmul.f32 %v2722_v24, %v675_v29  ;;  %v711_v54 = vperm.slane %v709_v25, 0  ;;  %v576_v27 = vand.u32 127, %v572_v23 }
 0x14a   : > { %v669_v44 = vsub.f32 1.5, %v668_v40  ;;  %v684_v49 = vmul.f32 %v2722_v24, %v677_v47  ;;  %v3114_v28 = vmov -1e+09  }
 0x14b   : > { %v649_v37 = vsub.f32 1.5, %v648_v33  ;;  %v689_v38 = vadd.f32 %v2723_v30, %v682_v34 }
 0x14c   : > { %v670_v48 = vmul.f32 %v2735_v17, %v669_v44  ;;  %v691_v51 = vadd.f32 %v2723_v30, %v684_v49 }
 0x14d   : > { %v650_v41 = vmul.f32 %v2737_v18, %v649_v37  ;;  %2494 = vmatmul.msk.f32.vlgmr.msra.gmra.mxu0 %vm583_vm0, %v689_v38 }
 0x14e   : > { %v674_v50 = vsel %vm673_vm13, %v2735_v17, %v670_v48 }
 0x14f   : > { %v654_v42 = vsel %vm653_vm10, %v2737_v18, %v650_v41  ;;  %v678_v52 = vmul.f32 %v674_v50, %v3344_v35  ;;  %v712_v35 = vperm.slane %v709_v25, 1 }
 0x150   : > { %v676_v26 = vmul.f32 %v654_v42, %v3347_v36 }
 0x151   : > { %v685_v36 = vmul.f32 %v2722_v24, %v678_v52 }
 0x152   : > { %v683_v45 = vmul.f32 %v2722_v24, %v676_v26  ;;  %v573_v24 = vshrl.u32 %v572_v23, 7 }
 0x153   : > { %v692_v53 = vadd.f32 %v2723_v30, %v685_v36 }
 0x154   : > { %v690_v46 = vadd.f32 %v2723_v30, %v683_v45  ;;  %vm577_vm15 = vcmp.le.s32.totalorder %v576_v27, %v573_v24  ;;  %v574_v30 = vadd.s32 8, %v573_v24 }
 0x155   : > { %v3476_v29 = vsel %vm577_vm15, 0.0, %v3114_v28 }
 0x156   : > { %2495 = vmatmul.msk.f32.gmra.mxu0 %vm583_vm0, %v690_v46  ;;  %2499 = vmatmul.msk.f32.vlgmr.msra.gmra.mxu1 %vm583_vm0, %v690_v46  ;;  %vm578_vm1 = vcmp.le.s32.totalorder %v576_v27, %v574_v30 }
 0x157   : > { %v3480_v34 = vsel %vm578_vm1, 0.0, %v3114_v28 }
 0x15e   : > { %2496 = vmatmul.msk.f32.gmra.mxu0 %vm583_vm0, %v691_v51  ;;  %2500 = vmatmul.msk.f32.gmra.mxu1 %vm583_vm0, %v691_v51 }
 0x166   : > { %2497 = vmatmul.msk.f32.gmra.mxu0 %vm583_vm0, %v692_v53  ;;  %2501 = vmatmul.msk.f32.gmra.mxu1 %vm583_vm0, %v692_v53 }
 0x16e   : > { %2498 = vmatmul.msk.f32.vlgmr.msrb.gmra.mxu0 %vm583_vm0, %v689_v38 }
 0x1ca   : > { %v744_v55 = vpop.f32.mrf.mxu0 }
 0x1cb   : > { %v3422_v56 = vadd.f32 %v744_v55, %v711_v54 }
 0x1cd   : > { %791 = vrot.lane.b32.xlu0 %v3422_v56, %s3111_s26  ;;  %v3441_v2 = vmul.f32 0.25, %v3422_v56 }
 0x1d3   : > { %v747_v57 = vpop.f32.mrf.mxu0  ;;  %v776_v58 = vpop.f32.mrf.mxu1 }
 0x1d4   : > { %v3425_v59 = vadd.f32 %v747_v57, %v711_v54  ;;  %v777_v60 = vadd.f32 %v776_v58, %v712_v35 }
 0x1d5   : > { %1026 = vrot.lane.b32.xlu0 %v3422_v56, %s3112_s24 }
 0x1d6   : > { %984 = vmatpush.msra.mxu2 %v777_v60  ;;  %793 = vrot.lane.b32.xlu2 %v3425_v59, %s3111_s26  ;;  %v3431_v62 = vmul.f32 0.25, %v3425_v59 }
 0x1db   : > { %v750_v61 = vpop.f32.mrf.mxu0  ;;  %v779_v12 = vpop.f32.mrf.mxu1 }
 0x1dc   : > { %v3433_v63 = vadd.f32 %v750_v61, %v711_v54  ;;  %v3464_v18 = vadd.f32 %v779_v12, %v712_v35 }
 0x1dd   : > { %1024 = vrot.lane.b32.xlu0 %v3431_v62, %s3113_s28 }
 0x1de   : > { %831 = vrot.lane.b32.xlu2 %v3433_v63, %s3111_s26  ;;  %v3462_v17 = vmul.f32 0.25, %v3433_v63 }
 0x1e3   : > { %v753_v0 = vpop.f32.mrf.mxu0  ;;  %v782_v14 = vpop.f32.mrf.mxu1 }
 0x1e4   : > { %v3438_v1 = vadd.f32 %v753_v0, %v711_v54  ;;  %v3457_v15 = vadd.f32 %v782_v14, %v712_v35 }
 0x1e6   : > { %833 = vrot.lane.b32.xlu1 %v3438_v1, %s3111_s26  ;;  %1022 = vrot.lane.b32.xlu2 %v3441_v2, %s3113_s28  ;;  %v3472_v22 = vmul.f32 0.25, %v3438_v1 }
 0x1eb   : > { %v773_v5 = vpop.f32.mrf.mxu0 }
 0x1ec   : > { %v774_v6 = vadd.f32 %v773_v5, %v712_v35 }
 0x1ee   : > { %985 = vmatpush.msra.mxu2 %v774_v6  ;;  %1028 = vrot.lane.b32.xlu1 %v3425_v59, %s3112_s24  ;;  %v3448_v7 = vpack.i.bf16 %v774_v6, %v777_v60 }
 0x230   : > { %v794_v8 = vpop.permute.xlu2 %793 }
 0x231   : > { %2502 = vmatpush.xpose.msk.msra.mxu3 %vm795_vm14, %v794_v8 }
 0x238   : > { %v832_v16 = vpop.permute.xlu2 %831 }
 0x23f   : > { %v792_v9 = vpop.permute.xlu0 %791 }
 0x240   : > { %2503 = vmatpush.xpose.msk.msra.mxu3 %vm795_vm14, %v792_v9  ;;  %v3498_v46 = vpop.permute.xlu2 %1022 }
 0x243   : > { %2504 = vmatmul.msk.f32.vlgmr.msra.gmra.mxu3 %vm795_vm14, %v3441_v2 }
 0x247   : > { %v1027_v21 = vpop.permute.xlu0 %1026 }
 0x24b   : > { %2505 = vmatmul.msk.f32.gmra.mxu3 %vm795_vm14, %v3431_v62 }
 0x24f   : > { %v3496_v45 = vpop.permute.xlu0 %1024 }
 0x258   : > { %v834_v13 = vpop.permute.xlu1 %833 }
 0x259   : > { %2506 = vmatpush.xpose.msk.msrb.mxu3 %vm795_vm14, %v834_v13 }
 0x25d   : > { %2507 = vmatpush.xpose.msk.msrb.mxu3 %vm795_vm14, %v832_v16 }
 0x260   : > { %v1029_v19 = vpop.permute.xlu1 %1028  ;;  %2508 = vmatmul.msk.f32.vlgmr.msrb.gmra.mxu3 %vm795_vm14, %v3462_v17 }
 0x261   : > { %1013 = vmatpush.msra.mxu3 %v3457_v15  ;;  %2514 = vmatpush.xpose.msk.msrb.mxu2 %vm795_vm14, %v1029_v19 }
 0x263   : > { %1014 = vmatpush.msra.mxu3 %v3464_v18 }
 0x265   : > { %2515 = vmatpush.xpose.msk.msrb.mxu2 %vm795_vm14, %v1027_v21 }
 0x268   : > { %2509 = vmatmul.msk.f32.gmra.mxu3 %vm795_vm14, %v3472_v22 }
 0x2c6   : > { %v823_v31 = vpop.f32.mrf.mxu3 }
 0x2c7   : > { %v824_v32 = vadd.f32 %v823_v31, %v3476_v29 }
 0x2c9   : > { %v868_v33 = vsel %vm795_vm14, %v824_v32, -inf }
 0x2ca   : > { %869 = vmax.xlane.f32.xlu0 %v868_v33 }
 0x2ce   : > { %v826_v37 = vpop.f32.mrf.mxu3 }
 0x2cf   : > { %v827_v38 = vadd.f32 %v826_v37, %v3480_v34 }
 0x2d1   : > { %v871_v39 = vsel %vm795_vm14, %v827_v38, -inf }
 0x2d2   : > { %872 = vmax.xlane.f32.xlu2 %v871_v39 }
 0x2de   : > { %1065 = vrot.lane.b32.xlu0 %v3433_v63, %s3112_s24 }
 0x2e3   : > { %v862_v40 = vpop.f32.mrf.mxu3 }
 0x2e4   : > { %v863_v41 = vadd.f32 %v862_v40, %v3476_v29 }
 0x2e6   : > { %v874_v42 = vsel %vm795_vm14, %v863_v41, -inf }
 0x2e7   : > { %875 = vmax.xlane.f32.xlu1 %v874_v42 }
 0x2ea   : > { %1276 = vrot.lane.b32.xlu2 %v3425_v59, %s3115_s20 }
 0x2eb   : > { %v865_v26 = vpop.f32.mrf.mxu3 }
 0x2ec   : > { %v866_v43 = vadd.f32 %v865_v26, %v3480_v34 }
 0x2ee   : > { %v877_v44 = vsel %vm795_vm14, %v866_v43, -inf }
 0x300   : > { %1067 = vrot.lane.b32.xlu1 %v3438_v1, %s3112_s24 }
 0x308   : > { %878 = vmax.xlane.f32.xlu0 %v877_v44 }
 0x31c   : > { %1270 = vrot.lane.b32.xlu0 %v3441_v2, %s3116_s27 }
 0x33d   : > { %v870_v47 = vpop.xlane.xlu0 %869 }
 0x33e   : > { %v880_v48 = vsub.f32 %v824_v32, %v870_v47 }
 0x340   : > { %v884_v49 = vmul.f32 1.442695, %v880_v48 }
 0x342   : > { %2738 = vpow2.f32 %v884_v49 }
 0x345   : > { %v873_v50 = vpop.xlane.xlu2 %872 }
 0x346   : > { %v881_v51 = vsub.f32 %v827_v38, %v873_v50 }
 0x348   : > { %v3500_v52 = vpop.eup %2738  ;;  %v886_v36 = vmul.f32 1.442695, %v881_v51 }
 0x349   : > { %v892_v53 = vsel %vm795_vm14, %v3500_v52, 0.0 }
 0x34a   : > { %2740 = vpow2.f32 %v886_v36  ;;  %893 = vadd.xlane.f32.xlu2 %v892_v53 }
 0x350   : > { %v3504_v25 = vpop.eup %2740  ;;  %v1066_v0 = vpop.permute.xlu0 %1065 }
 0x351   : > { %v895_v54 = vsel %vm795_vm14, %v3504_v25, 0.0 }
 0x352   : > { %896 = vadd.xlane.f32.xlu1 %v895_v54 }
 0x35a   : > { %v876_v55 = vpop.xlane.xlu1 %875 }
 0x35b   : > { %v882_v35 = vsub.f32 %v863_v41, %v876_v55 }
 0x35d   : > { %v888_v57 = vmul.f32 1.442695, %v882_v35 }
 0x35f   : > { %2742 = vpow2.f32 %v888_v57 }
 0x362   : > { %1061 = vrot.lane.b32.xlu2 %v3462_v17, %s3113_s28 }
 0x365   : > { %v3510_v58 = vpop.eup %2742 }
 0x366   : > { %v898_v60 = vsel %vm795_vm14, %v3510_v58, 0.0 }
 0x367   : > { %899 = vadd.xlane.f32.xlu0 %v898_v60 }
 0x36a   : > { %1272 = vrot.lane.b32.xlu2 %v3431_v62, %s3116_s27 }
 0x36b   : > { %1274 = vrot.lane.b32.xlu1 %v3422_v56, %s3115_s20 }
 0x372   : > { %v1068_v61 = vpop.permute.xlu1 %1067 }
 0x373   : > { %2518 = vmatpush.xpose.msk.msrb.mxu3 %vm795_vm14, %v1068_v61  ;;  %1063 = vrot.lane.b32.xlu1 %v3472_v22, %s3113_s28 }
 0x377   : > { %2519 = vmatpush.xpose.msk.msrb.mxu3 %vm795_vm14, %v1066_v0 }
 0x37b   : > { %1315 = vrot.lane.b32.xlu0 %v3438_v1, %s3115_s20  ;;  %1520 = vrot.lane.b32.xlu1 %v3425_v59, %s3117_s15  ;;  %v879_v5 = vpop.xlane.xlu0 %878  ;;  %v1277_v59 = vpop.permute.xlu2 %1276 }
 0x37c   : > { %v883_v6 = vsub.f32 %v866_v43, %v879_v5 }
 0x37e   : > { %v890_v8 = vmul.f32 1.442695, %v883_v6 }
 0x380   : > { %2744 = vpow2.f32 %v890_v8 }
 0x383   : > { %1518 = vrot.lane.b32.xlu0 %v3422_v56, %s3117_s15  ;;  %1309 = vrot.lane.b32.xlu1 %v3462_v17, %s3116_s27 }
 0x386   : > { %v3534_v9 = vpop.eup %2744 }
 0x387   : > { %v901_v56 = vsel %vm795_vm14, %v3534_v9, 0.0 }
 0x38b   : > { %1311 = vrot.lane.b32.xlu0 %v3472_v22, %s3116_s27  ;;  %1516 = vrot.lane.b32.xlu1 %v3431_v62, %s3118_s18 }
 0x38e   : > { %v1271_v33 = vpop.permute.xlu0 %1270 }
 0x393   : > { %1557 = vrot.lane.b32.xlu0 %v3433_v63, %s3117_s15  ;;  %1553 = vrot.lane.b32.xlu1 %v3462_v17, %s3118_s18 }
 0x394   : > { %902 = vadd.xlane.f32.xlu2 %v901_v56 }
 0x39b   : > { %2693 = vrot.lane.b32.xlu1 %v3448_v7, %s3113_s28 }
 0x3ac   : > { %1313 = vrot.lane.b32.xlu2 %v3433_v63, %s3115_s20 }
 0x3b4   : > { %1514 = vrot.lane.b32.xlu2 %v3441_v2, %s3118_s18 }
 0x3bc   : > { %1559 = vrot.lane.b32.xlu2 %v3438_v1, %s3117_s15 }
 0x3bd   : > { %v894_v62 = vpop.xlane.xlu2 %893 }
 0x3be   : > { %2746 = vrcp.f32 %v894_v62  ;;  %v915_v17 = vand.u32 2147483648, %v894_v62  ;;  %v913_v63 = vand.u32 2147483647, %v894_v62  ;;  %vm909_vm3 = vweird.f32 %v894_v62 }
 0x3c0   : > { %v916_v23 = vor.u32 1.1754944e-38, %v915_v17  ;;  %vm914_vm5 = vcmp.eq.f32.partialorder %v913_v63, 8.507059e+37 }
 0x3c4   : > { %v2747_v12 = vpop.eup %2746  ;;  %1555 = vrot.lane.b32.xlu2 %v3472_v22, %s3118_s18 }
 0x3c5   : > { %v905_v13 = vmul.f32 %v2747_v12, %v894_v62  ;;  %v897_v14 = vpop.xlane.xlu1 %896  ;;  %vm910_vm2 = vweird.f32 %v2747_v12  ;;  %v1062_v35 = vpop.permute.xlu2 %1061 }
 0x3c6   : > { %2748 = vrcp.f32 %v897_v14  ;;  %vm911_vm4 = vmor %vm909_vm3, %vm910_vm2  ;;  %v930_v30 = vand.u32 2147483648, %v897_v14  ;;  %v928_v32 = vand.u32 2147483647, %v897_v14  ;;  %vm924_vm7 = vweird.f32 %v897_v14 }
 0x3c7   : > { %v906_v16 = vsub.f32 1.0, %v905_v13 }
 0x3c8   : > { %v931_v38 = vor.u32 1.1754944e-38, %v930_v30  ;;  %vm929_vm9 = vcmp.eq.f32.partialorder %v928_v32, 8.507059e+37 }
 0x3c9   : > { %v907_v19 = vmul.f32 %v2747_v12, %v906_v16 }
 0x3cb   : > { %v908_v2 = vadd.f32 %v2747_v12, %v907_v19 }
 0x3cc   : > { %v2749_v21 = vpop.eup %2748 }
 0x3cd   : > { %v920_v1 = vmul.f32 %v2749_v21, %v897_v14  ;;  %v912_v24 = vsel %vm911_vm4, %v2747_v12, %v908_v2  ;;  %vm925_vm6 = vweird.f32 %v2749_v21 }
 0x3ce   : > { %v917_v27 = vsel %vm914_vm5, %v916_v23, %v912_v24  ;;  %vm926_vm8 = vmor %vm924_vm7, %vm925_vm6 }
 0x3cf   : > { %v921_v28 = vsub.f32 1.0, %v920_v1  ;;  %v918_v22 = vmul.f32 %v3500_v52, %v917_v27 }
 0x3d1   : > { %v922_v31 = vmul.f32 %v2749_v21, %v921_v28  ;;  %2510 = vmatmul.msk.f32.vlgmr.msra.gmra.mxu2 %vm795_vm14, %v918_v22 }
 0x3d2   : > { %2526 = vmatpush.xpose.msk.msra.mxu2 %vm795_vm14, %v1277_v59 }
 0x3d3   : > { %v923_v37 = vadd.f32 %v2749_v21, %v922_v31 }
 0x3d5   : > { %v927_v39 = vsel %vm926_vm8, %v2749_v21, %v923_v37 }
 0x3d6   : > { %v932_v40 = vsel %vm929_vm9, %v931_v38, %v927_v39 }
 0x3d7   : > { %v933_v41 = vmul.f32 %v3504_v25, %v932_v40 }
 0x3d9   : > { %2511 = vmatmul.msk.f32.gmra.mxu2 %vm795_vm14, %v933_v41 }
 0x3da   : > { %v900_v42 = vpop.xlane.xlu0 %899 }
 0x3db   : > { %2750 = vrcp.f32 %v900_v42  ;;  %v945_v48 = vand.u32 2147483648, %v900_v42  ;;  %v943_v51 = vand.u32 2147483647, %v900_v42  ;;  %vm939_vm11 = vweird.f32 %v900_v42 }
 0x3dd   : > { %v1275_v26 = vpop.permute.xlu1 %1274  ;;  %v946_v36 = vor.u32 1.1754944e-38, %v945_v48  ;;  %vm944_vm13 = vcmp.eq.f32.partialorder %v943_v51, 8.507059e+37 }
 0x3de   : > { %2527 = vmatpush.xpose.msk.msra.mxu2 %vm795_vm14, %v1275_v26 }
 0x3e1   : > { %v2751_v43 = vpop.eup %2750  ;;  %2516 = vmatmul.msk.f32.vlgmr.msrb.gmra.mxu2 %vm795_vm14, %v3498_v46 }
 0x3e2   : > { %v935_v44 = vmul.f32 %v2751_v43, %v900_v42  ;;  %vm940_vm10 = vweird.f32 %v2751_v43 }
 0x3e3   : > { %vm941_vm12 = vmor %vm939_vm11, %vm940_vm10 }
 0x3e4   : > { %v936_v47 = vsub.f32 1.0, %v935_v44 }
 0x3e5   : > { %v1064_v49 = vpop.permute.xlu1 %1063 }
 0x3e6   : > { %v937_v50 = vmul.f32 %v2751_v43, %v936_v47 }
 0x3e8   : > { %v938_v52 = vadd.f32 %v2751_v43, %v937_v50 }
 0x3e9   : > { %2517 = vmatmul.msk.f32.gmra.mxu2 %vm795_vm14, %v3496_v45  ;;  %v1273_v45 = vpop.permute.xlu2 %1272 }
 0x3ea   : > { %v942_v53 = vsel %vm941_vm12, %v2751_v43, %v938_v52 }
 0x3eb   : > { %v947_v25 = vsel %vm944_vm13, %v946_v36, %v942_v53 }
 0x3ec   : > { %v948_v54 = vmul.f32 %v3510_v58, %v947_v25 }
 0x3ed   : > { %v1316_v46 = vpop.permute.xlu0 %1315  ;;  %v1521_v55 = vpop.permute.xlu1 %1520 }
 0x3ee   : > { %2512 = vmatmul.msk.f32.vlgmr.msra.gmra.mxu3 %vm795_vm14, %v948_v54  ;;  %2538 = vmatpush.xpose.msk.msrb.mxu2 %vm795_vm14, %v1521_v55 }
 0x3ef   : > { %2530 = vmatpush.xpose.msk.msra.mxu3 %vm795_vm14, %v1316_v46 }
 0x3f1   : > { %2528 = vmatmul.msk.f32.vlgmr.msra.gmra.mxu2 %vm795_vm14, %v1271_v33 }
 0x3f5   : > { %v1519_v57 = vpop.permute.xlu0 %1518  ;;  %v1310_v60 = vpop.permute.xlu1 %1309 }
 0x3f6   : > { %2539 = vmatpush.xpose.msk.msrb.mxu2 %vm795_vm14, %v1519_v57 }
 0x3f9   : > { %2529 = vmatmul.msk.f32.gmra.mxu2 %vm795_vm14, %v1273_v45 }
 0x3fd   : > { %v1517_v61 = vpop.permute.xlu1 %1516  ;;  %v1312_v1 = vpop.permute.xlu0 %1311 }
 0x405   : > { %v1554_v58 = vpop.permute.xlu1 %1553  ;;  %v1558_v27 = vpop.permute.xlu0 %1557 }
 0x407   : > { %v903_v0 = vpop.xlane.xlu2 %902 }
 0x408   : > { %2752 = vrcp.f32 %v903_v0  ;;  %v960_v13 = vand.u32 2147483648, %v903_v0  ;;  %v958_v16 = vand.u32 2147483647, %v903_v0  ;;  %vm954_vm1 = vweird.f32 %v903_v0 }
 0x40a   : > { %v961_v19 = vor.u32 1.1754944e-38, %v960_v13  ;;  %vm959_vm3 = vcmp.eq.f32.partialorder %v958_v16, 8.507059e+37 }
 0x40d   : > { %v2694_v5 = vpop.permute.xlu1 %2693 }
 0x40e   : > { %v2753_v6 = vpop.eup %2752  ;;  %v2695_v8 = vunpack.i.l.bf16 %v2694_v5  ;;  %v2696_v62 = vunpack.i.h.bf16 %v2694_v5 }
 0x40f   : > { %v950_v56 = vmul.f32 %v2753_v6, %v903_v0  ;;  %v1314_v59 = vpop.permute.xlu2 %1313  ;;  %vm955_vm15 = vweird.f32 %v2753_v6 }
 0x410   : > { %2531 = vmatpush.xpose.msk.msra.mxu3 %vm795_vm14, %v1314_v59  ;;  %1224 = vmatpush.msra.mxu0 %v2695_v8  ;;  %vm956_vm2 = vmor %vm954_vm1, %vm955_vm15 }
 0x411   : > { %v951_v12 = vsub.f32 1.0, %v950_v56 }
 0x412   : > { %1225 = vmatpush.msra.mxu0 %v2696_v62 }
 0x413   : > { %v952_v14 = vmul.f32 %v2753_v6, %v951_v12 }
 0x415   : > { %v953_v17 = vadd.f32 %v2753_v6, %v952_v14 }
 0x417   : > { %v1515_v63 = vpop.permute.xlu2 %1514  ;;  %v957_v2 = vsel %vm956_vm2, %v2753_v6, %v953_v17 }
 0x418   : > { %2540 = vmatmul.msk.f32.vlgmr.msrb.gmra.mxu2 %vm795_vm14, %v1515_v63  ;;  %v962_v21 = vsel %vm959_vm3, %v961_v19, %v957_v2 }
 0x419   : > { %v963_v23 = vmul.f32 %v3534_v9, %v962_v21 }
 0x41b   : > { %2513 = vmatmul.msk.f32.gmra.mxu3 %vm795_vm14, %v963_v23 }
 0x41f   : > { %v1560_v24 = vpop.permute.xlu2 %1559 }
 0x420   : > { %2541 = vmatmul.msk.f32.gmra.mxu2 %vm795_vm14, %v1517_v61 }
 0x423   : > { %2520 = vmatmul.msk.f32.vlgmr.msrb.gmra.mxu3 %vm795_vm14, %v1062_v35 }
 0x424   : > { %2542 = vmatpush.xpose.msk.msrb.mxu3 %vm795_vm14, %v1560_v24 }
 0x427   : > { %v1556_v9 = vpop.permute.xlu2 %1555 }
 0x428   : > { %2543 = vmatpush.xpose.msk.msrb.mxu3 %vm795_vm14, %v1558_v27 }
 0x42b   : > { %2521 = vmatmul.msk.f32.gmra.mxu3 %vm795_vm14, %v1064_v49 }
 0x433   : > { %2532 = vmatmul.msk.f32.vlgmr.msra.gmra.mxu3 %vm795_vm14, %v1310_v60 }
 0x43b   : > { %2533 = vmatmul.msk.f32.gmra.mxu3 %vm795_vm14, %v1312_v1 }
 0x443   : > { %2544 = vmatmul.msk.f32.vlgmr.msrb.gmra.mxu3 %vm795_vm14, %v1554_v58 }
 0x44b   : > { %2545 = vmatmul.msk.f32.gmra.mxu3 %vm795_vm14, %v1556_v9  ;;  %v2707_v9 = vpack.i.bf16 %v3464_v18, %v3457_v15 }
 0x454   : > { %v3582_v28 = vpop.f32.mrf.mxu2 }
 0x45c   : > { %v3584_v22 = vpop.f32.mrf.mxu2 }
 0x464   : > { %v1055_v30 = vpop.f32.mrf.mxu2 }
 0x465   : > { %v1056_v31 = vadd.f32 %v1055_v30, %v3476_v29 }
 0x467   : > { %v1100_v32 = vsel %vm795_vm14, %v1056_v31, -inf }
 0x468   : > { %1101 = vmax.xlane.f32.xlu0 %v1100_v32 }
 0x46c   : > { %v1058_v33 = vpop.f32.mrf.mxu2 }
 0x46d   : > { %v1059_v37 = vadd.f32 %v1058_v33, %v3480_v34 }
 0x46f   : > { %v1103_v38 = vsel %vm795_vm14, %v1059_v37, -inf }
 0x470   : > { %1104 = vmax.xlane.f32.xlu1 %v1103_v38 }
 0x471   : > { %v3592_v42 = vpop.f32.mrf.mxu3 }
 0x474   : > { %v1303_v39 = vpop.f32.mrf.mxu2 }
 0x475   : > { %v1304_v40 = vadd.f32 %v1303_v39, %v3476_v29 }
 0x477   : > { %v1348_v41 = vsel %vm795_vm14, %v1304_v40, -inf }
 0x478   : > { %1349 = vmax.xlane.f32.xlu0 %v1348_v41 }
 0x47c   : > { %v1306_v47 = vpop.f32.mrf.mxu2 }
 0x47d   : > { %v3599_v49 = vadd.f32 %v1306_v47, %v3480_v34 }
 0x47f   : > { %v1351_v53 = vsel %vm795_vm14, %v3599_v49, -inf }
 0x49b   : > { %v1547_v52 = vpop.f32.mrf.mxu2 }
 0x49c   : > { %v3606_v25 = vadd.f32 %v1547_v52, %v3476_v29 }
 0x49e   : > { %v3594_v26 = vpop.f32.mrf.mxu3  ;;  %v1592_v35 = vsel %vm795_vm14, %v3606_v25, -inf }
 0x4a3   : > { %v1550_v57 = vpop.f32.mrf.mxu2 }
 0x4a4   : > { %v3613_v60 = vadd.f32 %v1550_v57, %v3480_v34 }
 0x4a6   : > { %v1094_v43 = vpop.f32.mrf.mxu3  ;;  %v1595_v58 = vsel %vm795_vm14, %v3613_v60, -inf }
 0x4a7   : > { %v1095_v44 = vadd.f32 %v1094_v43, %v3476_v29 }
 0x4a9   : > { %v1106_v48 = vsel %vm795_vm14, %v1095_v44, -inf }
 0x4aa   : > { %1107 = vmax.xlane.f32.xlu2 %v1106_v48 }
 0x4ae   : > { %v1097_v50 = vpop.f32.mrf.mxu3 }
 0x4af   : > { %v1098_v51 = vadd.f32 %v1097_v50, %v3480_v34 }
 0x4b1   : > { %v1109_v36 = vsel %vm795_vm14, %v1098_v51, -inf }
 0x4b2   : > { %1110 = vmax.xlane.f32.xlu1 %v1109_v36  ;;  %1352 = vmax.xlane.f32.xlu2 %v1351_v53 }
 0x4b6   : > { %v1342_v54 = vpop.f32.mrf.mxu3 }
 0x4b7   : > { %v1343_v46 = vadd.f32 %v1342_v54, %v3476_v29 }
 0x4b9   : > { %v1354_v55 = vsel %vm795_vm14, %v1343_v46, -inf }
 0x4ba   : > { %1355 = vmax.xlane.f32.xlu0 %v1354_v55  ;;  %1593 = vmax.xlane.f32.xlu1 %v1592_v35 }
 0x4be   : > { %v1345_v45 = vpop.f32.mrf.mxu3 }
 0x4bf   : > { %v3616_v61 = vadd.f32 %v1345_v45, %v3480_v34 }
 0x4c1   : > { %v1357_v0 = vsel %vm795_vm14, %v3616_v61, -inf }
 0x4c2   : > { %1596 = vmax.xlane.f32.xlu0 %v1595_v58  ;;  %1358 = vmax.xlane.f32.xlu2 %v1357_v0 }
 0x4c6   : > { %v1586_v5 = vpop.f32.mrf.mxu3 }
 0x4c7   : > { %v3623_v6 = vadd.f32 %v1586_v5, %v3476_v29 }
 0x4c9   : > { %v1598_v8 = vsel %vm795_vm14, %v3623_v6, -inf }
 0x4ca   : > { %1599 = vmax.xlane.f32.xlu1 %v1598_v8 }
 0x4ce   : > { %v1589_v56 = vpop.f32.mrf.mxu3 }
 0x4cf   : > { %v3628_v59 = vadd.f32 %v1589_v56, %v3480_v34 }
 0x4d1   : > { %v1601_v62 = vsel %vm795_vm14, %v3628_v59, -inf }
 0x4d2   : > { %1602 = vmax.xlane.f32.xlu0 %v1601_v62 }
 0x4db   : > { %v1102_v12 = vpop.xlane.xlu0 %1101 }
 0x4dc   : > { %v1112_v13 = vsub.f32 %v1056_v31, %v1102_v12 }
 0x4de   : > { %v1116_v14 = vmul.f32 1.442695, %v1112_v13 }
 0x4e0   : > { %2754 = vpow2.f32 %v1116_v14 }
 0x4e3   : > { %v1105_v16 = vpop.xlane.xlu1 %1104 }
 0x4e4   : > { %v1113_v17 = vsub.f32 %v1059_v37, %v1105_v16 }
 0x4e6   : > { %v3632_v29 = vpop.eup %2754  ;;  %v1118_v19 = vmul.f32 1.442695, %v1113_v17 }
 0x4e7   : > { %v1124_v63 = vsel %vm795_vm14, %v3632_v29, 0.0 }
 0x4e8   : > { %2756 = vpow2.f32 %v1118_v19  ;;  %1125 = vadd.xlane.f32.xlu2 %v1124_v63 }
 0x4eb   : > { %v1350_v34 = vpop.xlane.xlu0 %1349 }
 0x4ec   : > { %v1360_v2 = vsub.f32 %v1304_v40, %v1350_v34 }
 0x4ee   : > { %v3636_v21 = vpop.eup %2756  ;;  %v1364_v23 = vmul.f32 1.442695, %v1360_v2 }
 0x4ef   : > { %v1127_v1 = vsel %vm795_vm14, %v3636_v21, 0.0 }
 0x4f0   : > { %2758 = vpow2.f32 %v1364_v23  ;;  %1128 = vadd.xlane.f32.xlu1 %v1127_v1 }
 0x4f6   : > { %v3640_v24 = vpop.eup %2758 }
 0x4f7   : > { %v1372_v27 = vsel %vm795_vm14, %v3640_v24, 0.0 }
 0x4f8   : > { %1373 = vadd.xlane.f32.xlu0 %v1372_v27 }
 0x509   : > { %2708 = vrot.lane.b32.xlu1 %v2707_v9, %s3116_s27 }
 0x51d   : > { %v1108_v30 = vpop.xlane.xlu2 %1107 }
 0x51e   : > { %v1114_v31 = vsub.f32 %v1095_v44, %v1108_v30 }
 0x520   : > { %v1120_v32 = vmul.f32 1.442695, %v1114_v31 }
 0x522   : > { %2760 = vpow2.f32 %v1120_v32 }
 0x525   : > { %v1111_v33 = vpop.xlane.xlu1 %1110  ;;  %v1353_v37 = vpop.xlane.xlu2 %1352 }
 0x526   : > { %v1115_v38 = vsub.f32 %v1098_v51, %v1111_v33  ;;  %v1361_v39 = vsub.f32 %v3599_v49, %v1353_v37 }
 0x528   : > { %v3648_v40 = vpop.eup %2760  ;;  %v1122_v41 = vmul.f32 1.442695, %v1115_v38  ;;  %v1366_v43 = vmul.f32 1.442695, %v1361_v39 }
 0x529   : > { %v1130_v47 = vsel %vm795_vm14, %v3648_v40, 0.0 }
 0x52a   : > { %2762 = vpow2.f32 %v1122_v41  ;;  %1131 = vadd.xlane.f32.xlu2 %v1130_v47 }
 0x52b   : > { %2764 = vpow2.f32 %v1366_v43 }
 0x52d   : > { %v1356_v15 = vpop.xlane.xlu0 %1355  ;;  %v1594_v57 = vpop.xlane.xlu1 %1593 }
 0x52e   : > { %v1362_v18 = vsub.f32 %v1343_v46, %v1356_v15  ;;  %v1604_v58 = vsub.f32 %v3606_v25, %v1594_v57 }
 0x530   : > { %v3652_v44 = vpop.eup %2762  ;;  %v1368_v48 = vmul.f32 1.442695, %v1362_v18  ;;  %v1608_v5 = vmul.f32 1.442695, %v1604_v58 }
 0x531   : > { %v3654_v50 = vpop.eup %2764  ;;  %v1133_v49 = vsel %vm795_vm14, %v3652_v44, 0.0 }
 0x532   : > { %1134 = vadd.xlane.f32.xlu2 %v1133_v49  ;;  %v1375_v51 = vsel %vm795_vm14, %v3654_v50, 0.0  ;;  %2766 = vpow2.f32 %v1368_v48 }
 0x533   : > { %1376 = vadd.xlane.f32.xlu0 %v1375_v51 }
 0x535   : > { %v1359_v52 = vpop.xlane.xlu2 %1358  ;;  %v1597_v62 = vpop.xlane.xlu0 %1596 }
 0x536   : > { %v1363_v36 = vsub.f32 %v3616_v61, %v1359_v52  ;;  %v1605_v14 = vsub.f32 %v3613_v60, %v1597_v62 }
 0x538   : > { %v1370_v53 = vmul.f32 1.442695, %v1363_v36  ;;  %v3661_v54 = vpop.eup %2766  ;;  %v1610_v2 = vmul.f32 1.442695, %v1605_v14 }
 0x539   : > { %v1378_v46 = vsel %vm795_vm14, %v3661_v54, 0.0 }
 0x53a   : > { %2768 = vpow2.f32 %v1370_v53  ;;  %1379 = vadd.xlane.f32.xlu2 %v1378_v46 }
 0x53d   : > { %v1600_v45 = vpop.xlane.xlu1 %1599 }
 0x53e   : > { %v1606_v34 = vsub.f32 %v3623_v6, %v1600_v45 }
 0x540   : > { %v3665_v55 = vpop.eup %2768  ;;  %v1612_v31 = vmul.f32 1.442695, %v1606_v34 }
 0x541   : > { %v1381_v35 = vsel %vm795_vm14, %v3665_v55, 0.0 }
 0x542   : > { %1382 = vadd.xlane.f32.xlu1 %v1381_v35 }
 0x545   : > { %v1603_v33 = vpop.xlane.xlu0 %1602 }
 0x546   : > { %v1607_v41 = vsub.f32 %v3628_v59, %v1603_v33 }
 0x547   : > { %2703 = vrot.lane.b32.xlu0 %v3448_v7, %s3116_s27  ;;  %s551_s27 = sand.u32 1, %s3092_s30  }
 0x548   : > { %v1614_v48 = vmul.f32 1.442695, %v1607_v41  ;;  %s2336_s17 = scalar_lea.sflag [#allocation4], %s551_s27 }
 0x552   : > { %2698 = vrot.lane.b32.xlu2 %v2707_v9, %s3113_s28  ;;  %s3042_s28 = scalar_lea.hbm %s4223_s14, 64 }
 0x553   : > { %p3044_p4 = scmp.lt.s32.totalorder %s3042_s28, %s3038_s25 }
 0x555   : > { %p3045_p7 = por %p3044_p4, %p3043_p3 }
 0x557   : > { %p3046_p8 = pnand %p3045_p7, %p3041_p2 }
 0x55b   : > { %2718 = vrot.lane.b32.xlu1 %v2707_v9, %s3118_s18  ;;  %v1126_v61 = vpop.xlane.xlu2 %1125 }
 0x55c   : > { %2770 = vrcp.f32 %v1126_v61  ;;  %v1147_v13 = vand.u32 2147483648, %v1126_v61  ;;  %v1145_v17 = vand.u32 2147483647, %v1126_v61  ;;  %vm1141_vm5 = vweird.f32 %v1126_v61 }
 0x55e   : > { %v1148_v25 = vor.u32 1.1754944e-38, %v1147_v13  ;;  %vm1146_vm7 = vcmp.eq.f32.partialorder %v1145_v17, 8.507059e+37 }
 0x562   : > { %v2771_v0 = vpop.eup %2770 }
 0x563   : > { %v1137_v8 = vmul.f32 %v2771_v0, %v1126_v61  ;;  %v1129_v56 = vpop.xlane.xlu1 %1128  ;;  %vm1142_vm4 = vweird.f32 %v2771_v0 }
 0x564   : > { %2772 = vrcp.f32 %v1129_v56  ;;  %vm1143_vm6 = vmor %vm1141_vm5, %vm1142_vm4  ;;  %v1162_v32 = vand.u32 2147483648, %v1129_v56  ;;  %v1160_v6 = vand.u32 2147483647, %v1129_v56  ;;  %vm1156_vm9 = vweird.f32 %v1129_v56 }
 0x565   : > { %v1138_v12 = vsub.f32 1.0, %v1137_v8  ;;  %2774 = vpow2.f32 %v1608_v5 }
 0x566   : > { %2776 = vpow2.f32 %v1610_v2  ;;  %v1163_v43 = vor.u32 1.1754944e-38, %v1162_v32  ;;  %vm1161_vm11 = vcmp.eq.f32.partialorder %v1160_v6, 8.507059e+37 }
 0x567   : > { %v1139_v16 = vmul.f32 %v2771_v0, %v1138_v12  ;;  %2778 = vpow2.f32 %v1612_v31 }
 0x568   : > { %2780 = vpow2.f32 %v1614_v48 }
 0x569   : > { %v1140_v19 = vadd.f32 %v2771_v0, %v1139_v16 }
 0x56a   : > { %v2773_v63 = vpop.eup %2772 }
 0x56b   : > { %v1144_v23 = vsel %vm1143_vm6, %v2771_v0, %v1140_v19  ;;  %v1152_v1 = vmul.f32 %v2773_v63, %v1129_v56  ;;  %v3676_v27 = vpop.eup %2774  ;;  %vm1157_vm8 = vweird.f32 %v2773_v63 }
 0x56c   : > { %v1149_v9 = vsel %vm1146_vm7, %v1148_v25, %v1144_v23  ;;  %v1616_v38 = vsel %vm795_vm14, %v3676_v27, 0.0  ;;  %vm1158_vm10 = vmor %vm1156_vm9, %vm1157_vm8  ;;  %v3683_v15 = vpop.eup %2776 }
 0x56d   : > { %v1153_v30 = vsub.f32 1.0, %v1152_v1  ;;  %v1150_v60 = vmul.f32 %v3632_v29, %v1149_v9  ;;  %v3687_v49 = vpop.eup %2778  ;;  %v1619_v51 = vsel %vm795_vm14, %v3683_v15, 0.0 }
 0x56e   : > { %v1622_v59 = vsel %vm795_vm14, %v3687_v49, 0.0  ;;  %v3693_v52 = vpop.eup %2780 }
 0x56f   : > { %v1154_v37 = vmul.f32 %v2773_v63, %v1153_v30  ;;  %2522 = vmatmul.msk.f32.vlgmr.msra.gmra.mxu0 %vm795_vm14, %v1150_v60  ;;  %v1625_v36 = vsel %vm795_vm14, %v3693_v52, 0.0 }
 0x571   : > { %1617 = vadd.xlane.f32.xlu0 %v1616_v38  ;;  %v1155_v39 = vadd.f32 %v2773_v63, %v1154_v37 }
 0x573   : > { %v1159_v29 = vsel %vm1158_vm10, %v2773_v63, %v1155_v39 }
 0x574   : > { %v1164_v47 = vsel %vm1161_vm11, %v1163_v43, %v1159_v29 }
 0x575   : > { %v1165_v18 = vmul.f32 %v3636_v21, %v1164_v47  ;;  %v1374_v21 = vpop.xlane.xlu0 %1373 }
 0x576   : > { %2782 = vrcp.f32 %v1374_v21  ;;  %v1395_v25 = vand.u32 2147483648, %v1374_v21  ;;  %vm1389_vm1 = vweird.f32 %v1374_v21  ;;  %v1393_v23 = vand.u32 2147483647, %v1374_v21 }
 0x577   : > { %2523 = vmatmul.msk.f32.gmra.mxu0 %vm795_vm14, %v1165_v18 }
 0x578   : > { %v1396_v38 = vor.u32 1.1754944e-38, %v1395_v25  ;;  %vm1394_vm5 = vcmp.eq.f32.partialorder %v1393_v23, 8.507059e+37 }
 0x579   : > { %1620 = vadd.xlane.f32.xlu0 %v1619_v51 }
 0x57b   : > { %1623 = vadd.xlane.f32.xlu2 %v1622_v59  ;;  %v3709_v12 = vpop.permute.xlu1 %2708 }
 0x57c   : > { %v2783_v46 = vpop.eup %2782  ;;  %v2711_v59 = vunpack.i.h.bf16 %v3709_v12 }
 0x57d   : > { %v1385_v57 = vmul.f32 %v2783_v46, %v1374_v21  ;;  %vm1390_vm13 = vweird.f32 %v2783_v46 }
 0x57e   : > { %vm3722_vm3 = vmor %vm1389_vm1, %vm1390_vm13 }
 0x57f   : > { %v1386_v5 = vsub.f32 1.0, %v1385_v57 }
 0x581   : > { %v1387_v62 = vmul.f32 %v2783_v46, %v1386_v5 }
 0x583   : > { %1626 = vadd.xlane.f32.xlu2 %v1625_v36  ;;  %v1388_v63 = vadd.f32 %v2783_v46, %v1387_v62 }
 0x585   : > { %v1392_v33 = vsel %vm3722_vm3, %v2783_v46, %v1388_v63 }
 0x586   : > { %v1397_v18 = vsel %vm1394_vm5, %v1396_v38, %v1392_v33 }
 0x58d   : > { %2713 = vrot.lane.b32.xlu0 %v3448_v7, %s3118_s18 }
 0x59d   : > { %v1132_v53 = vpop.xlane.xlu2 %1131 }
 0x59e   : > { %2784 = vrcp.f32 %v1132_v53  ;;  %v1177_v34 = vand.u32 2147483648, %v1132_v53  ;;  %vm1171_vm15 = vweird.f32 %v1132_v53  ;;  %v1175_v2 = vand.u32 2147483647, %v1132_v53 }
 0x5a0   : > { %v1178_v37 = vor.u32 1.1754944e-38, %v1177_v34  ;;  %vm1176_vm4 = vcmp.eq.f32.partialorder %v1175_v2, 8.507059e+37 }
 0x5a4   : > { %v2785_v35 = vpop.eup %2784 }
 0x5a5   : > { %v1167_v45 = vmul.f32 %v2785_v35, %v1132_v53  ;;  %v3699_v61 = vpop.xlane.xlu2 %1134  ;;  %vm1172_vm12 = vweird.f32 %v2785_v35 }
 0x5a6   : > { %2786 = vrcp.f32 %v3699_v61  ;;  %v3702_v58 = vpop.xlane.xlu0 %1376  ;;  %vm3718_vm2 = vmor %vm1171_vm15, %vm1172_vm12  ;;  %v1192_v36 = vand.u32 2147483648, %v3699_v61  ;;  %vm1186_vm7 = vweird.f32 %v3699_v61  ;;  %v1190_v57 = vand.u32 2147483647, %v3699_v61 }
 0x5a7   : > { %2788 = vrcp.f32 %v3702_v58  ;;  %v1168_v0 = vsub.f32 1.0, %v1167_v45  ;;  %v2710_v45 = vunpack.i.l.bf16 %v3709_v12  ;;  %vm1404_vm10 = vweird.f32 %v3702_v58 }
 0x5a8   : > { %vm1191_vm11 = vcmp.eq.f32.partialorder %v1190_v57, 8.507059e+37 }
 0x5a9   : > { %v1169_v7 = vmul.f32 %v2785_v35, %v1168_v0  ;;  %v1398_v0 = vmul.f32 %v3640_v24, %v1397_v18 }
 0x5ab   : > { %v1170_v17 = vadd.f32 %v2785_v35, %v1169_v7 }
 0x5ac   : > { %v3705_v8 = vpop.eup %2786 }
 0x5ad   : > { %v3707_v56 = vpop.eup %2788  ;;  %v1182_v13 = vmul.f32 %v3705_v8, %v3699_v61  ;;  %v3713_v14 = vpop.xlane.xlu2 %1379  ;;  %v1174_v31 = vsel %vm3718_vm2, %v2785_v35, %v1170_v17  ;;  %vm1187_vm6 = vweird.f32 %v3705_v8  ;;  %v1193_v61 = vor.u32 1.1754944e-38, %v1192_v36 }
 0x5ae   : > { %v1400_v16 = vmul.f32 %v3707_v56, %v3702_v58  ;;  %2790 = vrcp.f32 %v3713_v14  ;;  %v1179_v47 = vsel %vm1176_vm4, %v1178_v37, %v1174_v31  ;;  %vm3748_vm8 = vmor %vm1186_vm7, %vm1187_vm6  ;;  %vm1405_vm9 = vweird.f32 %v3707_v56 }
 0x5af   : > { %v1183_v19 = vsub.f32 1.0, %v1182_v13  ;;  %v1180_v35 = vmul.f32 %v3648_v40, %v1179_v47  ;;  %v1410_v13 = vand.u32 2147483648, %v3702_v58  ;;  %v1408_v17 = vand.u32 2147483647, %v3702_v58  ;;  %vm1406_vm12 = vmor %vm1404_vm10, %vm1405_vm9 }
 0x5b0   : > { %v1401_v9 = vsub.f32 1.0, %v1400_v16  ;;  %v1425_v2 = vand.u32 2147483648, %v3713_v14  ;;  %vm1419_vm1 = vweird.f32 %v3713_v14  ;;  %v1423_v58 = vand.u32 2147483647, %v3713_v14 }
 0x5b1   : > { %v1184_v60 = vmul.f32 %v3705_v8, %v1183_v19  ;;  %vm1409_vm15 = vcmp.eq.f32.partialorder %v1408_v17, 8.507059e+37 }
 0x5b2   : > { %v1402_v43 = vmul.f32 %v3707_v56, %v1401_v9  ;;  %v1426_v30 = vor.u32 1.1754944e-38, %v1425_v2  ;;  %vm1424_vm3 = vcmp.eq.f32.partialorder %v1423_v58, 8.507059e+37 }
 0x5b3   : > { %v1185_v51 = vadd.f32 %v3705_v8, %v1184_v60 }
 0x5b4   : > { %v3729_v32 = vpop.eup %2790  ;;  %v1403_v7 = vadd.f32 %v3707_v56, %v1402_v43 }
 0x5b5   : > { %v3733_v6 = vpop.xlane.xlu1 %1382  ;;  %v1415_v39 = vmul.f32 %v3729_v32, %v3713_v14  ;;  %v2699_v41 = vpop.permute.xlu2 %2698  ;;  %v1189_v24 = vsel %vm3748_vm8, %v3705_v8, %v1185_v51  ;;  %v1411_v8 = vor.u32 1.1754944e-38, %v1410_v13  ;;  %vm1420_vm13 = vweird.f32 %v3729_v32 }
 0x5b6   : > { %2792 = vrcp.f32 %v3733_v6  ;;  %v2700_v29 = vunpack.i.l.bf16 %v2699_v41  ;;  %v2701_v53 = vunpack.i.h.bf16 %v2699_v41  ;;  %v1194_v19 = vsel %vm1191_vm11, %v1193_v61, %v1189_v24  ;;  %vm1421_vm2 = vmor %vm1419_vm1, %vm1420_vm13 }
 0x5b7   : > { %v1416_v48 = vsub.f32 1.0, %v1415_v39  ;;  %v1407_v63 = vsel %vm1406_vm12, %v3707_v56, %v1403_v7  ;;  %v1195_v23 = vmul.f32 %v3652_v44, %v1194_v19  ;;  %v1440_v14 = vand.u32 2147483648, %v3733_v6 }
 0x5b8   : > { %1261 = vmatpush.msrb.mxu1 %v2700_v29  ;;  %v1412_v1 = vsel %vm1409_vm15, %v1411_v8, %v1407_v63  ;;  %vm1434_vm5 = vweird.f32 %v3733_v6 }
 0x5b9   : > { %v2704_v21 = vpop.permute.xlu0 %2703  ;;  %v1417_v40 = vmul.f32 %v3729_v32, %v1416_v48  ;;  %v1413_v60 = vmul.f32 %v3654_v50, %v1412_v1  ;;  %v1441_v38 = vor.u32 1.1754944e-38, %v1440_v14 }
 0x5ba   : > { %v2705_v46 = vunpack.i.l.bf16 %v2704_v21  ;;  %1262 = vmatpush.msrb.mxu1 %v2701_v53  ;;  %v2706_v16 = vunpack.i.h.bf16 %v2704_v21 }
 0x5bb   : > { %2524 = vmatmul.msk.f32.vlgmr.msrb.gmra.mxu1 %vm795_vm14, %v1180_v35  ;;  %v1418_v34 = vadd.f32 %v3729_v32, %v1417_v40 }
 0x5bc   : > { %v2793_v62 = vpop.eup %2792  ;;  %1470 = vmatpush.msrb.mxu0 %v2705_v46  ;;  %1505 = vmatpush.msra.mxu1 %v2710_v45 }
 0x5bd   : > { %v1430_v12 = vmul.f32 %v2793_v62, %v3733_v6  ;;  %v1422_v9 = vsel %vm1421_vm2, %v3729_v32, %v1418_v34  ;;  %vm1435_vm4 = vweird.f32 %v2793_v62  ;;  %v1438_v32 = vand.u32 2147483647, %v3733_v6 }
 0x5be   : > { %1471 = vmatpush.msrb.mxu0 %v2706_v16  ;;  %1506 = vmatpush.msra.mxu1 %v2711_v59  ;;  %v1427_v31 = vsel %vm1424_vm3, %v1426_v30, %v1422_v9  ;;  %vm1436_vm6 = vmor %vm1434_vm5, %vm1435_vm4 }
 0x5bf   : > { %2534 = vmatmul.msk.f32.vlgmr.msrb.gmra.mxu0 %vm795_vm14, %v1398_v0  ;;  %v1431_v25 = vsub.f32 1.0, %v1430_v12  ;;  %v1428_v44 = vmul.f32 %v3661_v54, %v1427_v31  ;;  %vm1439_vm7 = vcmp.eq.f32.partialorder %v1438_v32, 8.507059e+37 }
 0x5c1   : > { %v1432_v56 = vmul.f32 %v2793_v62, %v1431_v25 }
 0x5c3   : > { %2525 = vmatmul.msk.f32.gmra.mxu1 %vm795_vm14, %v1195_v23  ;;  %v1433_v33 = vadd.f32 %v2793_v62, %v1432_v56 }
 0x5c5   : > { %v1437_v37 = vsel %vm1436_vm6, %v2793_v62, %v1433_v33 }
 0x5c6   : > { %v1442_v41 = vsel %vm1439_vm7, %v1441_v38, %v1437_v37 }
 0x5c7   : > { %2535 = vmatmul.msk.f32.gmra.mxu0 %vm795_vm14, %v1413_v60  ;;  %v1443_v29 = vmul.f32 %v3665_v55, %v1442_v41 }
 0x5cb   : > { %2536 = vmatmul.msk.f32.vlgmr.msra.gmra.mxu1 %vm795_vm14, %v1428_v44 }
 0x5cd   : > { %v2719_v50 = vpop.permute.xlu1 %2718 }
 0x5ce   : > { %v2720_v39 = vunpack.i.l.bf16 %v2719_v50  ;;  %v2721_v43 = vunpack.i.h.bf16 %v2719_v50 }
 0x5d0   : > { %1749 = vmatpush.msrb.mxu1 %v2720_v39 }
 0x5d2   : > { %1750 = vmatpush.msrb.mxu1 %v2721_v43 }
 0x5d3   : > { %2537 = vmatmul.msk.f32.gmra.mxu1 %vm795_vm14, %v1443_v29 }
 0x5e4   : > { %v1618_v47 = vpop.xlane.xlu0 %1617 }
 0x5e5   : > { %2794 = vrcp.f32 %v1618_v47  ;;  %vm1633_vm9 = vweird.f32 %v1618_v47  ;;  %v1639_v5 = vand.u32 2147483648, %v1618_v47  ;;  %v1637_v62 = vand.u32 2147483647, %v1618_v47 }
 0x5e7   : > { %v1640_v17 = vor.u32 1.1754944e-38, %v1639_v5  ;;  %vm1638_vm15 = vcmp.eq.f32.partialorder %v1637_v62, 8.507059e+37 }
 0x5eb   : > { %v2795_v54 = vpop.eup %2794 }
 0x5ec   : > { %v3784_v6 = vpop.xlane.xlu0 %1620  ;;  %v1227_v18 = vpop.f32.mrf.mxu0  ;;  %v1629_v48 = vmul.f32 %v2795_v54, %v1618_v47  ;;  %vm1634_vm8 = vweird.f32 %v2795_v54 }
 0x5ed   : > { %2796 = vrcp.f32 %v3784_v6  ;;  %1762 = vrot.lane.b32.xlu2 %v1227_v18, %s3117_s15  ;;  %vm1635_vm11 = vmor %vm1633_vm9, %vm1634_vm8  ;;  %vm1648_vm2 = vweird.f32 %v3784_v6  ;;  %v1654_v56 = vand.u32 2147483648, %v3784_v6  ;;  %v1652_v31 = vand.u32 2147483647, %v3784_v6 }
 0x5ee   : > { %v1624_v51 = vpop.xlane.xlu2 %1623  ;;  %v1630_v59 = vsub.f32 1.0, %v1629_v48 }
 0x5ef   : > { %2798 = vrcp.f32 %v1624_v51  ;;  %v1669_v7 = vand.u32 2147483648, %v1624_v51  ;;  %v1667_v40 = vand.u32 2147483647, %v1624_v51  ;;  %vm1663_vm12 = vweird.f32 %v1624_v51 }
 0x5f0   : > { %v1631_v21 = vmul.f32 %v2795_v54, %v1630_v59  ;;  %v1655_v37 = vor.u32 1.1754944e-38, %v1654_v56  ;;  %vm1653_vm9 = vcmp.eq.f32.partialorder %v1652_v31, 8.507059e+37 }
 0x5f1   : > { %v1670_v19 = vor.u32 1.1754944e-38, %v1669_v7  ;;  %vm1668_vm1 = vcmp.eq.f32.partialorder %v1667_v40, 8.507059e+37 }
 0x5f2   : > { %v1632_v57 = vadd.f32 %v2795_v54, %v1631_v21  ;;  %v1826_v21 = vld [vmem:[%s4215_s6 + $0x30] sm:$0xff] }
 0x5f3   : > { %v3788_v36 = vpop.eup %2796 }
 0x5f4   : > { %v1644_v55 = vmul.f32 %v3788_v36, %v3784_v6  ;;  %v1636_v16 = vsel %vm1635_vm11, %v2795_v54, %v1632_v57  ;;  %vm1649_vm3 = vweird.f32 %v3788_v36  ;;  %v1230_v29 = vpop.f32.mrf.mxu0  ;;  %v1822_v57 = vld [vmem:[%s4215_s6 + $0x10] sm:$0xff]  ;;  %vm1815_vm11 = vcmask 392192  }
 0x5f5   : > { %v2799_v53 = vpop.eup %2798  ;;  %v1641_v25 = vsel %vm1638_vm15, %v1640_v17, %v1636_v16  ;;  %vm1650_vm5 = vmor %vm1648_vm2, %vm1649_vm3 }
 0x5f6   : > { %v1659_v46 = vmul.f32 %v2799_v53, %v1624_v51  ;;  %v1627_v35 = vpop.xlane.xlu2 %1626  ;;  %v1645_v45 = vsub.f32 1.0, %v1644_v55  ;;  %vm1664_vm10 = vweird.f32 %v2799_v53  ;;  %v1642_v14 = vmul.f32 %v3676_v27, %v1641_v25 }
 0x5f7   : > { %2800 = vrcp.f32 %v1627_v35  ;;  %vm1665_vm13 = vmor %vm1663_vm12, %vm1664_vm10  ;;  %v1684_v30 = vand.u32 2147483648, %v1627_v35  ;;  %v1682_v44 = vand.u32 2147483647, %v1627_v35  ;;  %vm1678_vm6 = vweird.f32 %v1627_v35 }
 0x5f8   : > { %v1660_v0 = vsub.f32 1.0, %v1659_v46  ;;  %v1646_v24 = vmul.f32 %v3788_v36, %v1645_v45  ;;  %v1824_v46 = vld [vmem:[%s4215_s6 + $0x20] sm:$0xff]  ;;  %v1821_v45 = vld [vmem:[%s4215_s6 + $0x8] sm:$0xff]  ;;  %vm1810_vm10 = vcmask 261120  }
 0x5f9   : > { %v1685_v38 = vor.u32 1.1754944e-38, %v1684_v30  ;;  %vm1683_vm8 = vcmp.eq.f32.partialorder %v1682_v44, 8.507059e+37 }
 0x5fa   : > { %v1661_v13 = vmul.f32 %v2799_v53, %v1660_v0  ;;  %v1647_v9 = vadd.f32 %v3788_v36, %v1646_v24  ;;  %v1820_v0 = vld [vmem:[%s4215_s6] sm:$0xff] }
 0x5fc   : > { %v1662_v61 = vadd.f32 %v2799_v53, %v1661_v13  ;;  %v1651_v32 = vsel %vm1650_vm5, %v3788_v36, %v1647_v9  ;;  %v1827_v36 = vld [vmem:[%s4215_s6 + $0x38] sm:$0xff] }
 0x5fd   : > { %v2801_v12 = vpop.eup %2800  ;;  %v1656_v27 = vsel %vm1653_vm9, %v1655_v37, %v1651_v32  ;;  %1852 = vmatpush.msra.mxu2 %v1827_v36 }
 0x5fe   : > { %v1666_v63 = vsel %vm1665_vm13, %v2799_v53, %v1662_v61  ;;  %v1674_v8 = vmul.f32 %v2801_v12, %v1627_v35  ;;  %vm1679_vm4 = vweird.f32 %v2801_v12  ;;  %v1657_v43 = vmul.f32 %v3683_v15, %v1656_v27  ;;  %v1825_v53 = vld [vmem:[%s4215_s6 + $0x28] sm:$0xff]  ;;  %v1823_v35 = vld [vmem:[%s4215_s6 + $0x18] sm:$0xff] }
 0x5ff   : > { %v2714_v34 = vpop.permute.xlu0 %2713  ;;  %v1671_v2 = vsel %vm1668_vm1, %v1670_v19, %v1666_v63  ;;  %vm1680_vm7 = vmor %vm1678_vm6, %vm1679_vm4  ;;  %1853 = vmatpush.msra.mxu2 %v1826_v21 }
 0x600   : > { %v2715_v58 = vunpack.i.l.bf16 %v2714_v34  ;;  %v1675_v23 = vsub.f32 1.0, %v1674_v8  ;;  %v1672_v1 = vmul.f32 %v3687_v49, %v1671_v2  ;;  %v2716_v60 = vunpack.i.h.bf16 %v2714_v34 }
 0x601   : > { %1854 = vmatpush.msra.mxu2 %v1825_v53 }
 0x602   : > { %1714 = vmatpush.msra.mxu0 %v2715_v58  ;;  %v1676_v33 = vmul.f32 %v2801_v12, %v1675_v23  ;;  %2548 = vmatmul.msk.f32.vlgmr.msrb.gmra.mxu1 %vm795_vm14, %v1672_v1 }
 0x603   : > { %1855 = vmatpush.msra.mxu2 %v1824_v46 }
 0x604   : > { %1715 = vmatpush.msra.mxu0 %v2716_v60  ;;  %v1677_v49 = vadd.f32 %v2801_v12, %v1676_v33 }
 0x605   : > { %2546 = vmatmul.msk.f32.vlgmr.msra.gmra.mxu0 %vm795_vm14, %v1642_v14  ;;  %1856 = vmatpush.msra.mxu2 %v1823_v35 }
 0x606   : > { %v1681_v50 = vsel %vm1680_vm7, %v2801_v12, %v1677_v49 }
 0x607   : > { %v1686_v39 = vsel %vm1683_vm8, %v1685_v38, %v1681_v50  ;;  %1857 = vmatpush.msra.mxu2 %v1822_v57 }
 0x608   : > { %v1687_v41 = vmul.f32 %v3693_v52, %v1686_v39 }
 0x609   : > { %1858 = vmatpush.msra.mxu2 %v1821_v45  ;;  %v1995_v45 = vld [vmem:[%s4219_s10 + $0x70] sm:$0xff] }
 0x60a   : > { %2549 = vmatmul.msk.f32.gmra.mxu1 %vm795_vm14, %v1687_v41  ;;  %2023 = vmatpush.msra.mxu3 %v1995_v45 }
 0x60b   : > { %1859 = vmatpush.msra.mxu2 %v1820_v0  ;;  %v1996_v0 = vld [vmem:[%s4219_s10 + $0x78] sm:$0xff] }
 0x60c   : > { %2052 = vmatpush.msrb.mxu0 %v1996_v0 }
 0x60d   : > { %2547 = vmatmul.msk.f32.gmra.mxu0 %vm795_vm14, %v1657_v43 }
 0x638   : > { %v1264_v47 = vpop.f32.mrf.mxu1 }
 0x639   : > { %1766 = vrot.lane.b32.xlu2 %v1264_v47, %s3117_s15 }
 0x63c   : > { %v1473_v54 = vpop.f32.mrf.mxu0 }
 0x63d   : > { %1778 = vrot.lane.b32.xlu1 %v1473_v54, %s3115_s20 }
 0x640   : > { %v1267_v6 = vpop.f32.mrf.mxu1 }
 0x641   : > { %1768 = vrot.lane.b32.xlu2 %v1267_v6, %s3117_s15 }
 0x644   : > { %v1476_v18 = vpop.f32.mrf.mxu0 }
 0x645   : > { %1764 = vrot.lane.b32.xlu1 %v1230_v29, %s3117_s15  ;;  %s2490_s15 = sshll.u32 %s551_s27, 5 }
 0x646   : > { %s553_s18 = scalar_lea.vmem [#allocation13], %s2490_s15 }
 0x647   : > { %v1763_v7 = vpop.permute.xlu2 %1762  ;;  %s2349_s1 = sshll.u32 %s553_s18, 4  ;;  %s2350_s1 = int_to_ptr.vmem [resolvable:$true] %s2349_s1 }
 0x648   : > { %v1508_v52 = vpop.f32.mrf.mxu1  ;;  %v1806_v62 = vsel %vm795_vm14, %v3582_v28, %v1763_v7  ;;  %v1994_v7 = vld [vmem:[%s4219_s10 + $0x68] sm:$0xff] }
 0x649   : > { %2053 = vmatpush.msrb.mxu0 %v1994_v7 }
 0x650   : > { %v1511_v15 = vpop.f32.mrf.mxu1 }
 0x67f   : > { %v1752_v59 = vpop.f32.mrf.mxu1 }
 0x682   : > { %v1717_v48 = vpop.f32.mrf.mxu0 }
 0x683   : > { %1794 = vrot.lane.b32.xlu0 %v1717_v48, %s3112_s24 }
 0x687   : > { %v1755_v55 = vpop.f32.mrf.mxu1 }
 0x68a   : > { %v1720_v51 = vpop.f32.mrf.mxu0 }
 0x68b   : > { %1780 = vrot.lane.b32.xlu0 %v1476_v18, %s3115_s20  ;;  %1796 = vrot.lane.b32.xlu1 %v1720_v51, %s3112_s24 }
 0x693   : > { %1782 = vrot.lane.b32.xlu0 %v1508_v52, %s3115_s20  ;;  %1798 = vrot.lane.b32.xlu1 %v1752_v59, %s3112_s24  ;;  %v1767_v8 = vpop.permute.xlu2 %1766 }
 0x694   : > { %v1808_v28 = vsel %vm795_vm14, %v3592_v42, %v1767_v8  ;;  %v2724_v42 = vld [vmem:[#allocation8] ss:$0 sm:$0xff]  ;;  %v1981_v8 = vld [vmem:[%s4219_s10] sm:$0xff] }
 0x69b   : > { %1784 = vrot.lane.b32.xlu0 %v1511_v15, %s3115_s20  ;;  %1800 = vrot.lane.b32.xlu1 %v1755_v55, %s3112_s24 }
 0x6af   : > { %v1779_v5 = vpop.permute.xlu1 %1778 }
 0x6b0   : > { %v1811_v13 = vsel %vm1810_vm10, %v1806_v62, %v1779_v5  ;;  %v1993_v5 = vld [vmem:[%s4219_s10 + $0x60] sm:$0xff]  ;;  %v1991_v62 = vld [vmem:[%s4219_s10 + $0x50] sm:$0xff] }
 0x6b1   : > { %2024 = vmatpush.msra.mxu3 %v1993_v5 }
 0x6b3   : > { %2025 = vmatpush.msra.mxu3 %v1991_v62 }
 0x6b7   : > { %v1765_v40 = vpop.permute.xlu1 %1764 }
 0x6b8   : > { %v1807_v61 = vsel %vm795_vm14, %v3584_v22, %v1765_v40  ;;  %v1769_v22 = vpop.permute.xlu2 %1768  ;;  %v1989_v40 = vld [vmem:[%s4219_s10 + $0x40] sm:$0xff] }
 0x6b9   : > { %v1809_v23 = vsel %vm795_vm14, %v3594_v26, %v1769_v22  ;;  %2026 = vmatpush.msra.mxu3 %v1989_v40 }
 0x6f5   : > { %v1795_v16 = vpop.permute.xlu0 %1794 }
 0x6f6   : > { %v1816_v24 = vsel %vm1815_vm11, %v1811_v13, %v1795_v16  ;;  %v1992_v13 = vld [vmem:[%s4219_s10 + $0x58] sm:$0xff]  ;;  %v1990_v16 = vld [vmem:[%s4219_s10 + $0x48] sm:$0xff] }
 0x6f7   : > { %2550 = vmatmul.msk.f32.vlgmr.msra.gmra.mxu2 %vm583_vm0, %v1816_v24  ;;  %2054 = vmatpush.msrb.mxu0 %v1992_v13  ;;  %v1987_v24 = vld [vmem:[%s4219_s10 + $0x30] sm:$0xff] }
 0x6f8   : > { %2027 = vmatpush.msra.mxu3 %v1987_v24 }
 0x6f9   : > { %2055 = vmatpush.msrb.mxu0 %v1990_v16 }
 0x6fd   : > { %v1781_v12 = vpop.permute.xlu0 %1780  ;;  %v1797_v17 = vpop.permute.xlu1 %1796 }
 0x6fe   : > { %v1812_v19 = vsel %vm1810_vm10, %v1807_v61, %v1781_v12  ;;  %v1988_v61 = vld [vmem:[%s4219_s10 + $0x38] sm:$0xff]  ;;  %v1985_v12 = vld [vmem:[%s4219_s10 + $0x20] sm:$0xff] }
 0x6ff   : > { %v1817_v63 = vsel %vm1815_vm11, %v1812_v19, %v1797_v17  ;;  %2056 = vmatpush.msrb.mxu0 %v1988_v61  ;;  %v1986_v17 = vld [vmem:[%s4219_s10 + $0x28] sm:$0xff]  ;;  %2028 = vmatpush.msra.mxu3 %v1985_v12  ;;  %v1983_v19 = vld [vmem:[%s4219_s10 + $0x10] sm:$0xff] }
 0x700   : > { %2551 = vmatmul.msk.f32.gmra.mxu2 %vm583_vm0, %v1817_v63  ;;  %v1984_v63 = vld [vmem:[%s4219_s10 + $0x18] sm:$0xff] }
 0x701   : > { %2057 = vmatpush.msrb.mxu0 %v1986_v17  ;;  %2029 = vmatpush.msra.mxu3 %v1983_v19  ;;  %v2263_v19 = vld [vmem:[%s4221_s12 + $0xf0] sm:$0xff] }
 0x703   : > { %2058 = vmatpush.msrb.mxu0 %v1984_v63  ;;  %2030 = vmatpush.msra.mxu3 %v1981_v8  ;;  %v2248_v63 = vld [vmem:[%s4221_s12 + $0x78] sm:$0xff]  ;;  %v2261_v8 = vld [vmem:[%s4221_s12 + $0xe0] sm:$0xff] }
 0x704   : > { %2269 = vmatpush.msra.mxu1 %v2248_v63 }
 0x705   : > { %v1783_v34 = vpop.permute.xlu0 %1782  ;;  %v1799_v25 = vpop.permute.xlu1 %1798 }
 0x706   : > { %v1813_v2 = vsel %vm1810_vm10, %v1808_v28, %v1783_v34  ;;  %v1982_v28 = vld [vmem:[%s4219_s10 + $0x8] sm:$0xff] }
 0x707   : > { %v1818_v58 = vsel %vm1815_vm11, %v1813_v2, %v1799_v25  ;;  %2059 = vmatpush.msrb.mxu0 %v1982_v28  ;;  %v2247_v28 = vld [vmem:[%s4221_s12 + $0x70] sm:$0xff] }
 0x708   : > { %2552 = vmatmul.msk.f32.gmra.mxu2 %vm583_vm0, %v1818_v58  ;;  %2270 = vmatpush.msra.mxu1 %v2247_v28 }
 0x70d   : > { %v1785_v1 = vpop.permute.xlu0 %1784  ;;  %v1801_v9 = vpop.permute.xlu1 %1800 }
 0x70e   : > { %v1814_v56 = vsel %vm1810_vm10, %v1809_v23, %v1785_v1 }
 0x70f   : > { %v1819_v30 = vsel %vm1815_vm11, %v1814_v56, %v1801_v9 }
 0x710   : > { %2553 = vmatmul.msk.f32.gmra.mxu2 %vm583_vm0, %v1819_v30 }
 0x77a   : > { %v1861_v60 = vpop.f32.mrf.mxu2 }
 0x77b   : > { %v1862_v31 = vadd.f32 %v2724_v42, %v1861_v60 }
 0x77d   : > { %v3865_v33 = vadd.f32 %v1862_v31, %v3311_v4 }
 0x77f   : > { %v1879_v14 = vsel %vm583_vm0, %v3865_v33, 0.0 }
 0x780   : > { %1880 = vadd.xlane.f32.xlu2 %v1879_v14 }
 0x783   : > { %v1864_v44 = vpop.f32.mrf.mxu2 }
 0x784   : > { %v1865_v26 = vadd.f32 %v2724_v42, %v1864_v44 }
 0x786   : > { %v3870_v49 = vadd.f32 %v1865_v26, %v3319_v11 }
 0x788   : > { %v1882_v32 = vsel %vm583_vm0, %v3870_v49, 0.0 }
 0x789   : > { %1883 = vadd.xlane.f32.xlu0 %v1882_v32  ;;  %v2725_v32 = vld [vmem:[#allocation10] ss:$0 sm:$0xff] }
 0x78b   : > { %v1867_v37 = vpop.f32.mrf.mxu2 }
 0x78c   : > { %v1868_v38 = vadd.f32 %v2724_v42, %v1867_v37 }
 0x78e   : > { %v3875_v50 = vadd.f32 %v1868_v38, %v3309_v3 }
 0x790   : > { %v1885_v4 = vsel %vm583_vm0, %v3875_v50, 0.0 }
 0x791   : > { %1886 = vadd.xlane.f32.xlu1 %v1885_v4 }
 0x793   : > { %v1870_v39 = vpop.f32.mrf.mxu2 }
 0x794   : > { %v1871_v27 = vadd.f32 %v2724_v42, %v1870_v39 }
 0x796   : > { %v3880_v41 = vadd.f32 %v1871_v27, %v3317_v10  ;;  %v2726_v27 = vld [vmem:[#allocation11] ss:$0 sm:$0xff] }
 0x798   : > { %v1888_v11 = vsel %vm583_vm0, %v3880_v41, 0.0 }
 0x799   : > { %1889 = vadd.xlane.f32.xlu2 %v1888_v11 }
 0x7f3   : > { %v1881_v43 = vpop.xlane.xlu2 %1880 }
 0x7f4   : > { %v1891_v29 = vmul.f32 %v1881_v43, %v3325_v20 }
 0x7f6   : > { %v3886_v47 = vsub.f32 %v3865_v33, %v1891_v29 }
 0x7f8   : > { %v1899_v3 = vmul.f32 %v3886_v47, %v3886_v47 }
 0x7fa   : > { %v1903_v54 = vsel %vm583_vm0, %v1899_v3, 0.0 }
 0x7fb   : > { %1904 = vadd.xlane.f32.xlu0 %v1903_v54 }
 0x7fc   : > { %v1884_v6 = vpop.xlane.xlu0 %1883 }
 0x7fd   : > { %v1892_v10 = vmul.f32 %v1884_v6, %v3325_v20 }
 0x7ff   : > { %v3893_v18 = vsub.f32 %v3870_v49, %v1892_v10 }
 0x801   : > { %v1900_v52 = vmul.f32 %v3893_v18, %v3893_v18 }
 0x803   : > { %v1906_v48 = vsel %vm583_vm0, %v1900_v52, 0.0 }
 0x804   : > { %1907 = vadd.xlane.f32.xlu1 %v1906_v48  ;;  %v1887_v15 = vpop.xlane.xlu1 %1886 }
 0x805   : > { %v1893_v51 = vmul.f32 %v1887_v15, %v3325_v20 }
 0x807   : > { %v3900_v59 = vsub.f32 %v3875_v50, %v1893_v51 }
 0x809   : > { %v1901_v36 = vmul.f32 %v3900_v59, %v3900_v59 }
 0x80b   : > { %v1909_v21 = vsel %vm583_vm0, %v1901_v36, 0.0 }
 0x80c   : > { %v1890_v55 = vpop.xlane.xlu2 %1889  ;;  %1910 = vadd.xlane.f32.xlu2 %v1909_v21 }
 0x80d   : > { %v1894_v53 = vmul.f32 %v1890_v55, %v3325_v20 }
 0x80f   : > { %v3907_v46 = vsub.f32 %v3880_v41, %v1894_v53 }
 0x811   : > { %v1902_v35 = vmul.f32 %v3907_v46, %v3907_v46 }
 0x813   : > { %v1912_v57 = vsel %vm583_vm0, %v1902_v35, 0.0 }
 0x814   : > { %1913 = vadd.xlane.f32.xlu0 %v1912_v57 }
 0x86e   : > { %v1905_v34 = vpop.xlane.xlu0 %1904 }
 0x86f   : > { %v1915_v25 = vmul.f32 %v1905_v34, %v3325_v20  ;;  %v2260_v34 = vld [vmem:[%s4221_s12 + $0xd8] sm:$0xff] }
 0x871   : > { %v1919_v2 = vadd.f32 1e-05, %v1915_v25  ;;  %v2246_v25 = vld [vmem:[%s4221_s12 + $0x68] sm:$0xff] }
 0x872   : > { %2271 = vmatpush.msra.mxu1 %v2246_v25 }
 0x873   : > { %2802 = vrsqrt.f32 %v1919_v2  ;;  %vm1929_vm12 = vweird.f32 %v1919_v2 }
 0x877   : > { %v1908_v58 = vpop.xlane.xlu1 %1907 }
 0x878   : > { %v1916_v22 = vmul.f32 %v1908_v58, %v3325_v20  ;;  %v2245_v58 = vld [vmem:[%s4221_s12 + $0x60] sm:$0xff] }
 0x879   : > { %v2803_v23 = vpop.eup %2802  ;;  %2272 = vmatpush.msra.mxu1 %v2245_v58 }
 0x87a   : > { %v1924_v1 = vmul.f32 %v2803_v23, %v1919_v2  ;;  %v1920_v9 = vadd.f32 1e-05, %v1916_v22  ;;  %vm1930_vm14 = vweird.f32 %v2803_v23  ;;  %v2259_v2 = vld [vmem:[%s4221_s12 + $0xd0] sm:$0xff]  ;;  %v2258_v22 = vld [vmem:[%s4221_s12 + $0xc8] sm:$0xff] }
 0x87b   : > { %vm1931_vm13 = vmor %vm1929_vm12, %vm1930_vm14 }
 0x87c   : > { %v1925_v56 = vmul.f32 %v2803_v23, %v1924_v1  ;;  %2804 = vrsqrt.f32 %v1920_v9  ;;  %vm1939_vm1 = vweird.f32 %v1920_v9  ;;  %v2257_v1 = vld [vmem:[%s4221_s12 + $0xc0] sm:$0xff] }
 0x87e   : > { %v1926_v30 = vmul.f32 0.5, %v1925_v56  ;;  %v2256_v56 = vld [vmem:[%s4221_s12 + $0xb8] sm:$0xff] }
 0x87f   : > { %v1911_v42 = vpop.xlane.xlu2 %1910 }
 0x880   : > { %v1927_v60 = vsub.f32 1.5, %v1926_v30  ;;  %v1917_v31 = vmul.f32 %v1911_v42, %v3325_v20  ;;  %v2242_v30 = vld [vmem:[%s4221_s12 + $0x48] sm:$0xff]  ;;  %v2255_v42 = vld [vmem:[%s4221_s12 + $0xb0] sm:$0xff] }
 0x882   : > { %v2805_v14 = vpop.eup %2804  ;;  %v1928_v44 = vmul.f32 %v2803_v23, %v1927_v60  ;;  %v1921_v26 = vadd.f32 1e-05, %v1917_v31  ;;  %v2241_v60 = vld [vmem:[%s4221_s12 + $0x40] sm:$0xff]  ;;  %v2254_v31 = vld [vmem:[%s4221_s12 + $0xa8] sm:$0xff] }
 0x883   : > { %v1934_v37 = vmul.f32 %v2805_v14, %v1920_v9  ;;  %vm1940_vm15 = vweird.f32 %v2805_v14  ;;  %v2243_v9 = vld [vmem:[%s4221_s12 + $0x50] sm:$0xff] }
 0x884   : > { %v1932_v38 = vsel %vm1931_vm13, %v2803_v23, %v1928_v44  ;;  %2806 = vrsqrt.f32 %v1921_v26  ;;  %vm1941_vm2 = vmor %vm1939_vm1, %vm1940_vm15  ;;  %vm1949_vm4 = vweird.f32 %v1921_v26  ;;  %v2244_v23 = vld [vmem:[%s4221_s12 + $0x58] sm:$0xff] }
 0x885   : > { %v1963_v4 = vmul.f32 %v1932_v38, %v3886_v47  ;;  %v1935_v39 = vmul.f32 %v2805_v14, %v1934_v37  ;;  %2273 = vmatpush.msra.mxu1 %v2244_v23  ;;  %v2240_v44 = vld [vmem:[%s4221_s12 + $0x38] sm:$0xff]  ;;  %v2239_v37 = vld [vmem:[%s4221_s12 + $0x30] sm:$0xff] }
 0x886   : > { %v2252_v38 = vld [vmem:[%s4221_s12 + $0x98] sm:$0xff] }
 0x887   : > { %v1970_v11 = vmul.f32 %v2725_v32, %v1963_v4  ;;  %v1936_v43 = vmul.f32 0.5, %v1935_v39  ;;  %v1914_v29 = vpop.xlane.xlu0 %1913  ;;  %2274 = vmatpush.msra.mxu1 %v2243_v9  ;;  %v2238_v4 = vld [vmem:[%s4221_s12 + $0x28] sm:$0xff]  ;;  %v2251_v39 = vld [vmem:[%s4221_s12 + $0x90] sm:$0xff] }
 0x888   : > { %v1918_v3 = vmul.f32 %v1914_v29, %v3325_v20  ;;  %v2250_v29 = vld [vmem:[%s4221_s12 + $0x88] sm:$0xff] }
 0x889   : > { %v1937_v54 = vsub.f32 1.5, %v1936_v43  ;;  %v1977_v6 = vadd.f32 %v2726_v27, %v1970_v11  ;;  %2275 = vmatpush.msra.mxu1 %v2242_v30  ;;  %v2237_v43 = vld [vmem:[%s4221_s12 + $0x20] sm:$0xff] }
 0x88a   : > { %v2807_v10 = vpop.eup %2806  ;;  %v1922_v52 = vadd.f32 1e-05, %v1918_v3 }
 0x88b   : > { %v1938_v48 = vmul.f32 %v2805_v14, %v1937_v54  ;;  %v1944_v15 = vmul.f32 %v2807_v10, %v1921_v26  ;;  %2554 = vmatmul.msk.f32.vlgmr.msra.gmra.mxu3 %vm583_vm0, %v1977_v6  ;;  %2558 = vmatmul.msk.f32.vlgmr.msrb.gmra.mxu0 %vm583_vm0, %v1977_v6  ;;  %vm1950_vm3 = vweird.f32 %v2807_v10  ;;  %v2253_v26 = vld [vmem:[%s4221_s12 + $0xa0] sm:$0xff]  ;;  %v2236_v6 = vld [vmem:[%s4221_s12 + $0x18] sm:$0xff] }
 0x88c   : > { %2808 = vrsqrt.f32 %v1922_v52  ;;  %vm1951_vm5 = vmor %vm1949_vm4, %vm1950_vm3  ;;  %vm1959_vm7 = vweird.f32 %v1922_v52  ;;  %2276 = vmatpush.msra.mxu1 %v2241_v60 }
 0x88d   : > { %v1942_v47 = vsel %vm1941_vm2, %v2805_v14, %v1938_v48  ;;  %v1945_v51 = vmul.f32 %v2807_v10, %v1944_v15  ;;  %v1997_v14 = vld [vmem:[%s4220_s11] sm:$0x3]  ;;  %v2235_v48 = vld [vmem:[%s4221_s12 + $0x10] sm:$0xff] }
 0x88e   : > { %v1964_v36 = vmul.f32 %v1942_v47, %v3893_v18  ;;  %2277 = vmatpush.msra.mxu1 %v2240_v44  ;;  %v4066_v54 = vperm.slane %v1997_v14, 0 }
 0x88f   : > { %v1946_v21 = vmul.f32 0.5, %v1945_v51  ;;  %v2234_v51 = vld [vmem:[%s4221_s12 + $0x8] sm:$0xff] }
 0x890   : > { %v1971_v20 = vmul.f32 %v2725_v32, %v1964_v36  ;;  %2278 = vmatpush.msra.mxu1 %v2239_v37 }
 0x891   : > { %v1947_v55 = vsub.f32 1.5, %v1946_v21 }
 0x892   : > { %v2809_v53 = vpop.eup %2808  ;;  %v1978_v35 = vadd.f32 %v2726_v27, %v1971_v20  ;;  %2279 = vmatpush.msra.mxu1 %v2238_v4  ;;  %v2233_v20 = vld [vmem:[%s4221_s12] sm:$0xff] }
 0x893   : > { %v1948_v57 = vmul.f32 %v2807_v10, %v1947_v55  ;;  %v1954_v45 = vmul.f32 %v2809_v53, %v1922_v52  ;;  %vm1960_vm6 = vweird.f32 %v2809_v53 }
 0x894   : > { %2555 = vmatmul.msk.f32.gmra.mxu3 %vm583_vm0, %v1978_v35  ;;  %2559 = vmatmul.msk.f32.gmra.mxu0 %vm583_vm0, %v1978_v35  ;;  %vm1961_vm8 = vmor %vm1959_vm7, %vm1960_vm6 }
 0x895   : > { %v1952_v0 = vsel %vm1951_vm5, %v2807_v10, %v1948_v57  ;;  %v1955_v5 = vmul.f32 %v2809_v53, %v1954_v45  ;;  %2280 = vmatpush.msra.mxu1 %v2237_v43  ;;  %v2249_v10 = vld [vmem:[%s4221_s12 + $0x80] sm:$0xff] }
 0x896   : > { %v1965_v7 = vmul.f32 %v1952_v0, %v3900_v59  ;;  %v2264_v59 = vld [vmem:[%s4221_s12 + $0xf8] sm:$0xff] }
 0x897   : > { %v1956_v62 = vmul.f32 0.5, %v1955_v5  ;;  %2298 = vmatpush.msrb.mxu2 %v2264_v59  ;;  %2281 = vmatpush.msra.mxu1 %v2236_v6 }
 0x898   : > { %v1972_v18 = vmul.f32 %v2725_v32, %v1965_v7 }
 0x899   : > { %v1957_v13 = vsub.f32 1.5, %v1956_v62  ;;  %2299 = vmatpush.msrb.mxu2 %v2263_v19  ;;  %2282 = vmatpush.msra.mxu1 %v2235_v48 }
 0x89a   : > { %v1979_v40 = vadd.f32 %v2726_v27, %v1972_v18 }
 0x89b   : > { %v1958_v16 = vmul.f32 %v2809_v53, %v1957_v13  ;;  %2283 = vmatpush.msra.mxu1 %v2234_v51 }
 0x89c   : > { %2556 = vmatmul.msk.f32.gmra.mxu3 %vm583_vm0, %v1979_v40  ;;  %2560 = vmatmul.msk.f32.gmra.mxu0 %vm583_vm0, %v1979_v40 }
 0x89d   : > { %v1962_v24 = vsel %vm1961_vm8, %v2809_v53, %v1958_v16  ;;  %2284 = vmatpush.msra.mxu1 %v2233_v20 }
 0x89e   : > { %v1966_v61 = vmul.f32 %v1962_v24, %v3907_v46  ;;  %v2262_v46 = vld [vmem:[%s4221_s12 + $0xe8] sm:$0xff] }
 0x89f   : > { %2300 = vmatpush.msrb.mxu2 %v2262_v46 }
 0x8a0   : > { %v1973_v12 = vmul.f32 %v2725_v32, %v1966_v61  ;;  %v4042_v32 = vperm.slane %v1997_v14, 1 }
 0x8a1   : > { %2301 = vmatpush.msrb.mxu2 %v2261_v8 }
 0x8a2   : > { %v1980_v17 = vadd.f32 %v2726_v27, %v1973_v12 }
 0x8a3   : > { %2302 = vmatpush.msrb.mxu2 %v2260_v34 }
 0x8a4   : > { %2557 = vmatmul.msk.f32.gmra.mxu3 %vm583_vm0, %v1980_v17  ;;  %2561 = vmatmul.msk.f32.gmra.mxu0 %vm583_vm0, %v1980_v17 }
 0x8a5   : > { %2303 = vmatpush.msrb.mxu2 %v2259_v2 }
 0x8a7   : > { %2304 = vmatpush.msrb.mxu2 %v2258_v22 }
 0x8a9   : > { %2305 = vmatpush.msrb.mxu2 %v2257_v1 }
 0x8ab   : > { %2306 = vmatpush.msrb.mxu2 %v2256_v56 }
 0x8ad   : > { %2307 = vmatpush.msrb.mxu2 %v2255_v42 }
 0x8af   : > { %2308 = vmatpush.msrb.mxu2 %v2254_v31 }
 0x8b1   : > { %2309 = vmatpush.msrb.mxu2 %v2253_v26 }
 0x8b3   : > { %2310 = vmatpush.msrb.mxu2 %v2252_v38 }
 0x8b5   : > { %2311 = vmatpush.msrb.mxu2 %v2251_v39 }
 0x8b7   : > { %2312 = vmatpush.msrb.mxu2 %v2250_v29 }
 0x8b9   : > { %2313 = vmatpush.msrb.mxu2 %v2249_v10 }
 0x908   : > { %v2061_v27 = vpop.f32.mrf.mxu0 }
 0x909   : > { %v4057_v11 = vadd.f32 %v2061_v27, %v4042_v32 }
 0x90b   : > { %v2074_v3 = vmul.f32 -1.702, %v4057_v11 }
 0x90d   : > { %v2083_v52 = vmul.f32 1.442695, %v2074_v3 }
 0x90e   : > { %v2032_v15 = vpop.f32.mrf.mxu3 }
 0x90f   : > { %2810 = vpow2.f32 %v2083_v52  ;;  %v4078_v47 = vadd.f32 %v2032_v15, %v4066_v54 }
 0x911   : > { %v2073_v36 = vmul.f32 -1.702, %v4078_v47  ;;  %v2064_v21 = vpop.f32.mrf.mxu0 }
 0x912   : > { %v4088_v55 = vadd.f32 %v2064_v21, %v4042_v32 }
 0x913   : > { %v2081_v53 = vmul.f32 1.442695, %v2073_v36 }
 0x914   : > { %v2076_v35 = vmul.f32 -1.702, %v4088_v55 }
 0x915   : > { %v2811_v57 = vpop.eup %2810  ;;  %2812 = vpow2.f32 %v2081_v53 }
 0x916   : > { %v2098_v45 = vadd.f32 1.0, %v2811_v57  ;;  %v2087_v0 = vmul.f32 1.442695, %v2076_v35 }
 0x917   : > { %v2035_v5 = vpop.f32.mrf.mxu3 }
 0x918   : > { %2814 = vrcp.f32 %v2098_v45  ;;  %v4092_v7 = vadd.f32 %v2035_v5, %v4066_v54  ;;  %v2129_v34 = vand.u32 2147483647, %v2098_v45  ;;  %v2131_v25 = vand.u32 2147483648, %v2098_v45 }
 0x919   : > { %2816 = vpow2.f32 %v2087_v0  ;;  %v2067_v62 = vpop.f32.mrf.mxu0  ;;  %vm2125_vm10 = vweird.f32 %v2098_v45 }
 0x91a   : > { %v4095_v18 = vadd.f32 %v2067_v62, %v4042_v32  ;;  %v2075_v40 = vmul.f32 -1.702, %v4092_v7  ;;  %vm2130_vm11 = vcmp.eq.f32.partialorder %v2129_v34, 8.507059e+37  ;;  %v2132_v60 = vor.u32 1.1754944e-38, %v2131_v25 }
 0x91b   : > { %v2813_v13 = vpop.eup %2812 }
 0x91c   : > { %v2097_v16 = vadd.f32 1.0, %v2813_v13  ;;  %v2078_v24 = vmul.f32 -1.702, %v4095_v18  ;;  %v2085_v61 = vmul.f32 1.442695, %v2075_v40 }
 0x91e   : > { %v2815_v12 = vpop.eup %2814  ;;  %2818 = vrcp.f32 %v2097_v16  ;;  %v2091_v19 = vmul.f32 1.442695, %v2078_v24  ;;  %v2114_v14 = vand.u32 2147483647, %v2097_v16  ;;  %v2116_v4 = vand.u32 2147483648, %v2097_v16 }
 0x91f   : > { %v2817_v17 = vpop.eup %2816  ;;  %v2121_v59 = vmul.f32 %v2815_v12, %v2098_v45  ;;  %2820 = vpow2.f32 %v2085_v61  ;;  %v2038_v46 = vpop.f32.mrf.mxu3  ;;  %vm2126_vm9 = vweird.f32 %v2815_v12  ;;  %vm2110_vm13 = vweird.f32 %v2097_v16 }
 0x920   : > { %v4099_v63 = vadd.f32 1.0, %v2817_v17  ;;  %v4102_v8 = vadd.f32 %v2038_v46, %v4066_v54  ;;  %2822 = vpow2.f32 %v2091_v19  ;;  %vm2127_vm14 = vmor %vm2125_vm10, %vm2126_vm9  ;;  %vm2115_vm15 = vcmp.eq.f32.partialorder %v2114_v14, 8.507059e+37 }
 0x921   : > { %v2122_v28 = vsub.f32 1.0, %v2121_v59  ;;  %v2070_v2 = vpop.f32.mrf.mxu0 }
 0x922   : > { %2824 = vrcp.f32 %v4099_v63  ;;  %v2077_v58 = vmul.f32 -1.702, %v4102_v8  ;;  %v4107_v22 = vadd.f32 %v2070_v2, %v4042_v32  ;;  %v2161_v20 = vand.u32 2147483648, %v4099_v63 }
 0x923   : > { %v2123_v23 = vmul.f32 %v2815_v12, %v2122_v28  ;;  %vm2155_vm3 = vweird.f32 %v4099_v63 }
 0x924   : > { %v2819_v1 = vpop.eup %2818  ;;  %v2089_v9 = vmul.f32 1.442695, %v2077_v58  ;;  %v2080_v56 = vmul.f32 -1.702, %v4107_v22  ;;  %v2162_v61 = vor.u32 1.1754944e-38, %v2161_v20 }
 0x925   : > { %v2821_v30 = vpop.eup %2820  ;;  %v2124_v42 = vadd.f32 %v2815_v12, %v2123_v23  ;;  %v2106_v31 = vmul.f32 %v2819_v1, %v2097_v16  ;;  %vm2111_vm12 = vweird.f32 %v2819_v1 }
 0x926   : > { %v4110_v44 = vadd.f32 1.0, %v2821_v30  ;;  %2826 = vpow2.f32 %v2089_v9  ;;  %v2095_v26 = vmul.f32 1.442695, %v2080_v56  ;;  %v2823_v32 = vpop.eup %2822  ;;  %vm2112_vm1 = vmor %vm2110_vm13, %vm2111_vm12 }
 0x927   : > { %v2128_v37 = vsel %vm2127_vm14, %v2815_v12, %v2124_v42  ;;  %v2107_v38 = vsub.f32 1.0, %v2106_v31  ;;  %v2041_v39 = vpop.f32.mrf.mxu3  ;;  %v4113_v29 = vadd.f32 1.0, %v2823_v32 }
 0x928   : > { %v2825_v27 = vpop.eup %2824  ;;  %v2133_v43 = vsel %vm2130_vm11, %v2132_v60, %v2128_v37  ;;  %2828 = vrcp.f32 %v4110_v44  ;;  %v4116_v3 = vadd.f32 %v2041_v39, %v4066_v54  ;;  %v2117_v54 = vor.u32 1.1754944e-38, %v2116_v4 }
 0x929   : > { %v2226_v6 = vmul.f32 %v2133_v43, %v4057_v11  ;;  %v2108_v10 = vmul.f32 %v2819_v1, %v2107_v38  ;;  %2830 = vpow2.f32 %v2095_v26  ;;  %v2151_v52 = vmul.f32 %v2825_v27, %v4099_v63 }
 0x92a   : > { %2832 = vrcp.f32 %v4113_v29  ;;  %v2079_v48 = vmul.f32 -1.702, %v4116_v3  ;;  %v2159_v11 = vand.u32 2147483647, %v4099_v63  ;;  %vm2156_vm2 = vweird.f32 %v2825_v27 }
 0x92b   : > { %v2109_v15 = vadd.f32 %v2819_v1, %v2108_v10  ;;  %2314 = vmatmul.f32.vlgmr.msrb.gmra.mxu2 %v2226_v6  ;;  %v2152_v51 = vsub.f32 1.0, %v2151_v52  ;;  %vm2157_vm4 = vmor %vm2155_vm3, %vm2156_vm2  ;;  %v2146_v46 = vand.u32 2147483648, %v4110_v44  ;;  %vm2140_vm7 = vweird.f32 %v4110_v44 }
 0x92c   : > { %v2827_v36 = vpop.eup %2826  ;;  %v2093_v21 = vmul.f32 1.442695, %v2079_v48  ;;  %vm2160_vm5 = vcmp.eq.f32.partialorder %v2159_v11, 8.507059e+37  ;;  %v2189_v2 = vand.u32 2147483647, %v4113_v29  ;;  %v2191_v58 = vand.u32 2147483648, %v4113_v29 }
 0x92d   : > { %v2113_v53 = vsel %vm2112_vm1, %v2819_v1, %v2109_v15  ;;  %v4125_v35 = vadd.f32 1.0, %v2827_v36  ;;  %v2153_v57 = vmul.f32 %v2825_v27, %v2152_v51  ;;  %v2147_v30 = vor.u32 1.1754944e-38, %v2146_v46 }
 0x92e   : > { %v2829_v45 = vpop.eup %2828  ;;  %v2118_v0 = vsel %vm2115_vm15, %v2117_v54, %v2113_v53  ;;  %2834 = vpow2.f32 %v2093_v21  ;;  %vm2185_vm10 = vweird.f32 %v4113_v29  ;;  %vm2190_vm12 = vcmp.eq.f32.partialorder %v2189_v2, 8.507059e+37 }
 0x92f   : > { %v2831_v5 = vpop.eup %2830  ;;  %v2225_v62 = vmul.f32 %v2118_v0, %v4078_v47  ;;  %2836 = vrcp.f32 %v4125_v35  ;;  %v2154_v13 = vadd.f32 %v2825_v27, %v2153_v57  ;;  %v2136_v40 = vmul.f32 %v2829_v45, %v4110_v44 }
 0x930   : > { %v2833_v16 = vpop.eup %2832  ;;  %v4131_v24 = vadd.f32 1.0, %v2831_v5  ;;  %v2144_v47 = vand.u32 2147483647, %v4110_v44  ;;  %vm2141_vm6 = vweird.f32 %v2829_v45  ;;  %v2192_v44 = vor.u32 1.1754944e-38, %v2191_v58 }
 0x931   : > { %2285 = vmatmul.f32.vlgmr.msra.gmra.mxu1 %v2225_v62  ;;  %v2158_v12 = vsel %vm2157_vm4, %v2825_v27, %v2154_v13  ;;  %v2137_v17 = vsub.f32 1.0, %v2136_v40  ;;  %v2181_v59 = vmul.f32 %v2833_v16, %v4113_v29  ;;  %vm2186_vm8 = vweird.f32 %v2833_v16  ;;  %vm2142_vm9 = vmor %vm2140_vm7, %vm2141_vm6 }
 0x932   : > { %2838 = vrcp.f32 %v4131_v24  ;;  %v2163_v19 = vsel %vm2160_vm5, %v2162_v61, %v2158_v12  ;;  %vm2145_vm11 = vcmp.eq.f32.partialorder %v2144_v47, 8.507059e+37  ;;  %vm2187_vm14 = vmor %vm2185_vm10, %vm2186_vm8  ;;  %v2176_v38 = vand.u32 2147483648, %v4125_v35  ;;  %v2727_v61 = vld [vmem:[%s4222_s13] ss:$0 sm:$0xff] }
 0x933   : > { %v2228_v63 = vmul.f32 %v2163_v19, %v4088_v55  ;;  %v2138_v28 = vmul.f32 %v2829_v45, %v2137_v17  ;;  %v2182_v34 = vsub.f32 1.0, %v2181_v59  ;;  %v2174_v43 = vand.u32 2147483647, %v4125_v35 }
 0x934   : > { %v2835_v25 = vpop.eup %2834  ;;  %vm2170_vm15 = vweird.f32 %v4125_v35  ;;  %v2221_v52 = vand.u32 2147483648, %v4131_v24  ;;  %v2177_v48 = vor.u32 1.1754944e-38, %v2176_v38  ;;  %v2219_v51 = vand.u32 2147483647, %v4131_v24 }
 0x935   : > { %v2837_v23 = vpop.eup %2836  ;;  %v4141_v1 = vadd.f32 1.0, %v2835_v25  ;;  %2317 = vmatmul.f32.gmra.mxu2 %v2228_v63  ;;  %v2139_v9 = vadd.f32 %v2829_v45, %v2138_v28  ;;  %v2183_v56 = vmul.f32 %v2833_v16, %v2182_v34  ;;  %vm2175_vm3 = vcmp.eq.f32.partialorder %v2174_v43, 8.507059e+37 }
 0x936   : > { %v2166_v55 = vmul.f32 %v2837_v23, %v4125_v35  ;;  %vm2171_vm13 = vweird.f32 %v2837_v23  ;;  %vm2215_vm4 = vweird.f32 %v4131_v24  ;;  %v2222_v20 = vor.u32 1.1754944e-38, %v2221_v52 }
 0x937   : > { %2840 = vrcp.f32 %v4141_v1  ;;  %v2143_v42 = vsel %vm2142_vm9, %v2829_v45, %v2139_v9  ;;  %v2184_v60 = vadd.f32 %v2833_v16, %v2183_v56  ;;  %vm2172_vm1 = vmor %vm2170_vm15, %vm2171_vm13  ;;  %vm2220_vm6 = vcmp.eq.f32.partialorder %v2219_v51, 8.507059e+37 }
 0x938   : > { %v2839_v31 = vpop.eup %2838  ;;  %v2148_v14 = vsel %vm2145_vm11, %v2147_v30, %v2143_v42  ;;  %v2167_v26 = vsub.f32 1.0, %v2166_v55  ;;  %v2206_v57 = vand.u32 2147483648, %v4141_v1  ;;  %v2204_v5 = vand.u32 2147483647, %v4141_v1 }
 0x939   : > { %v2227_v32 = vmul.f32 %v2148_v14, %v4092_v7  ;;  %v2188_v37 = vsel %vm2187_vm14, %v2833_v16, %v2184_v60  ;;  %v2211_v4 = vmul.f32 %v2839_v31, %v4131_v24  ;;  %vm2216_vm2 = vweird.f32 %v2839_v31 }
 0x93a   : > { %v2193_v39 = vsel %vm2190_vm12, %v2192_v44, %v2188_v37  ;;  %v2168_v27 = vmul.f32 %v2837_v23, %v2167_v26  ;;  %vm2217_vm5 = vmor %vm2215_vm4, %vm2216_vm2  ;;  %vm2200_vm8 = vweird.f32 %v4141_v1  ;;  %vm2205_vm10 = vcmp.eq.f32.partialorder %v2204_v5, 8.507059e+37 }
 0x93b   : > { %2288 = vmatmul.f32.gmra.mxu1 %v2227_v32  ;;  %v2230_v29 = vmul.f32 %v2193_v39, %v4095_v18  ;;  %v2212_v6 = vsub.f32 1.0, %v2211_v4 }
 0x93c   : > { %v2169_v10 = vadd.f32 %v2837_v23, %v2168_v27 }
 0x93d   : > { %v2841_v7 = vpop.eup %2840  ;;  %2320 = vmatmul.f32.gmra.mxu2 %v2230_v29  ;;  %v2213_v15 = vmul.f32 %v2839_v31, %v2212_v6 }
 0x93e   : > { %v2173_v36 = vsel %vm2172_vm1, %v2837_v23, %v2169_v10  ;;  %v2196_v54 = vmul.f32 %v2841_v7, %v4141_v1  ;;  %vm2201_vm7 = vweird.f32 %v2841_v7 }
 0x93f   : > { %v2178_v21 = vsel %vm2175_vm3, %v2177_v48, %v2173_v36  ;;  %v2214_v18 = vadd.f32 %v2839_v31, %v2213_v15  ;;  %vm2202_vm9 = vmor %vm2200_vm8, %vm2201_vm7 }
 0x940   : > { %v2229_v11 = vmul.f32 %v2178_v21, %v4102_v8  ;;  %v2197_v53 = vsub.f32 1.0, %v2196_v54  ;;  %v2207_v8 = vor.u32 1.1754944e-38, %v2206_v57 }
 0x941   : > { %v2218_v35 = vsel %vm2217_vm5, %v2839_v31, %v2214_v18 }
 0x942   : > { %v2223_v45 = vsel %vm2220_vm6, %v2222_v20, %v2218_v35  ;;  %v2198_v0 = vmul.f32 %v2841_v7, %v2197_v53 }
 0x943   : > { %2291 = vmatmul.f32.gmra.mxu1 %v2229_v11  ;;  %v2232_v62 = vmul.f32 %v2223_v45, %v4107_v22 }
 0x944   : > { %v2199_v13 = vadd.f32 %v2841_v7, %v2198_v0 }
 0x945   : > { %2323 = vmatmul.f32.gmra.mxu2 %v2232_v62 }
 0x946   : > { %v2203_v40 = vsel %vm2202_vm9, %v2841_v7, %v2199_v13 }
 0x947   : > { %v2208_v16 = vsel %vm2205_vm10, %v2207_v8, %v2203_v40 }
 0x948   : > { %v2231_v24 = vmul.f32 %v2208_v16, %v4116_v3 }
 0x94b   : > { %2294 = vmatmul.f32.gmra.mxu1 %v2231_v24 }
 0x9ae   : > { %v2286_v12 = vpop.f32.mrf.mxu1  ;;  %v2315_v22 = vpop.f32.mrf.mxu2 }
 0x9af   : > { %v2287_v17 = vadd.f32 %v2727_v61, %v2286_v12 }
 0x9b1   : > { %v2316_v59 = vadd.f32 %v2315_v22, %v2287_v17 }
 0x9b3   : > { %v2327_v19 = vadd.f32 %v2316_v59, %v3865_v33 }
 0x9b5   : > { %2331 = vst.msk [vmem:[%s553_s18] sm:$0xff] %vm583_vm0, %v2327_v19 }
 0x9b8   : > { %v2289_v47 = vpop.f32.mrf.mxu1  ;;  %v2318_v3 = vpop.f32.mrf.mxu2 }
 0x9b9   : > { %v2290_v46 = vadd.f32 %v2727_v61, %v2289_v47 }
 0x9bb   : > { %v2319_v63 = vadd.f32 %v2318_v3, %v2290_v46 }
 0x9bd   : > { %v2328_v28 = vadd.f32 %v2319_v63, %v3870_v49 }
 0x9bf   : > { %2332 = vst.msk [vmem:[%s553_s18 + $0x8] sm:$0xff] %vm583_vm0, %v2328_v28 }
 0x9c0   : > { %v2292_v34 = vpop.f32.mrf.mxu1  ;;  %v2321_v25 = vpop.f32.mrf.mxu2 }
 0x9c1   : > { %v2293_v2 = vadd.f32 %v2727_v61, %v2292_v34 }
 0x9c3   : > { %v2322_v58 = vadd.f32 %v2321_v25, %v2293_v2 }
 0x9c5   : > { %v2329_v23 = vadd.f32 %v2322_v58, %v3875_v50 }
 0x9c7   : > { %2333 = vst.msk [vmem:[%s553_s18 + $0x10] sm:$0xff] %vm583_vm0, %v2329_v23 }
 0x9c8   : > { %v2295_v33 = vpop.f32.mrf.mxu1  ;;  %v2324_v1 = vpop.f32.mrf.mxu2 }
 0x9c9   : > { %v2296_v49 = vadd.f32 %v2727_v61, %v2295_v33 }
 0x9cb   : > { %v2325_v9 = vadd.f32 %v2324_v1, %v2296_v49 }
 0x9cd   : > { %v2330_v56 = vadd.f32 %v2325_v9, %v3880_v41 }
 0x9cf   : > { %2334 = vst.msk [vmem:[%s553_s18 + $0x18] sm:$0xff] %vm583_vm0, %v2330_v56 }
 0x9d0   : > { %3049 = shalt.err (!%p3046_p8)
}
 0x9d1   : > { %s3119_s27 = smov 128   ;;  %s3120_s15 = smov 8  }
 0x9d2   : > { %2603 = dma.vmem_to_hbm [thread:$0]  (%p3234_p5), %s2350_s1, 512, %s2352_s16, %s2336_s17, %s3119_s27, %s3119_s27, %s3120_s15  }
 0x9d3 PF: > { %s4256_s18 = sld [smem:[#allocation21_spill]] }
 0x9d4   : > { %s4257_s7 = sld [smem:[#allocation19_spill]] }
 0x9d9   : > { %p2640_p9 = scmp.ge.s32.totalorder %s4256_s18, 2 }
 0x9da   : > { %s2366_s22 = sand.u32 1, %s4257_s7  }
 0x9db   : > { %p2625_p10 = pnand %p2640_p9, %p3238_p6  ;;  %s2367_s2 = scalar_lea.sflag [#allocation4], %s2366_s22 }
 0x9dd   : > { %p2626_p11 = pneg %p2625_p10 }
 0x9df   : > { %3083 = dma.done.wait (%p2626_p11), %s2367_s2, 512  }
 0x9e0   : > { %3085 = vsyncadd (%p2626_p11), %s2367_s2, 4294966784  ;;  %s4259_s16 = sld [smem:[#allocation22_spill]]  ;;  %s4262_s29 = smov %s3092_s30 }
 0x9e1   : > { %s4260_s19 = sld [smem:[#allocation20_spill]] }
 0x9e2   : > { %s4261_s15 = sld [smem:[#allocation23_spill]] }
 0x9e6   : > { %p28_p12 = scmp.ge.s32.totalorder %s4259_s16, 4  }
 0x9e7   : > { %s4263_s30 = smov %s4260_s19 }
 0x9e8   :  { %30 = sbr.rel (!%p28_p12) target bundleno = 11 (0xb), region = 136 }
 0x9ed   :  { %2373 = vsyncpa [#allocation3], 1 }
 0x9ee   :  { %2375 = vsyncpa [#allocation3 + $0x1], 1 }
 0x9ef   :  { %2376 = vsyncpa [#allocation6], 1 }
 0x9f0   :  { %2377 = vsyncpa [#allocation9], 1 }
 0x9f1   :  { %2378 = vsyncpa [#allocation12], 1 }
 0x9f2   :  { %2379 = vsyncpa [#allocation4], 1 }
 0x9f3   :  { %2381 = vsyncpa [#allocation4 + $0x1], 1 }

</bundles_post_ra>
